<compile_context>
chip_gen: v6e
topology: v6e:2x2x1
jax: 0.10.0
libtpu: 0.0.40
codegen_flags: <defaults>
</compile_context>

<pallas_src>
import functools

import jax
import jax.numpy as jnp
import numpy as np
from jax.experimental import pallas as pl
from jax.experimental.pallas import tpu as pltpu

# ----------------------------- model config ---------------------------------
VOCAB_SIZE = 64
HIDDEN_DIM = 32
NUM_HEADS = 4
HEAD_DIM = HIDDEN_DIM // NUM_HEADS
NUM_LAYERS = 2
MAX_LENGTH = 128
BATCH = 2
SEQ = 8
FFN_DIM = HIDDEN_DIM * 4
LN_EPS = 1e-5
OUT_PAD = 128          # LM head padded to a full 128-lane output
NEG_BIG = -1e30        # additive mask value (finite; exp() underflows to 0)

# packed weight-slab column offsets: [wqkv | wo | w1 | w2^T]
_W_QKV = 0
_W_O = 3 * HIDDEN_DIM                   # 96
_W_1 = _W_O + HIDDEN_DIM                # 128
_W_2T = _W_1 + FFN_DIM                  # 256
_W_END = _W_2T + FFN_DIM                # 384


def _layernorm(x, g, b):
    mu = jnp.mean(x, axis=-1, keepdims=True)
    var = jnp.mean((x - mu) ** 2, axis=-1, keepdims=True)
    return (x - mu) * jax.lax.rsqrt(var + LN_EPS) * g + b


# ------------------------------ Pallas kernel --------------------------------
def mlm_kernel(
    x_ref,       # (N, H)        N = B*S flattened token rows
    bias_ref,    # (N, N)        additive attention bias (batch block + padding)
    hmask_ref,   # (NH*N, H)     0/1 head block-diagonal selector
    wslab_ref,   # (L, H, 384)   [wqkv (Q pre-scaled) | wo | w1 | w2^T]
    vslab_ref,   # (L, 8, 128)   packed per-layer bias / LN vectors
    fc_ref,      # (40, 128)     rows 0..H-1 = wfc (LN-affine folded), row H = bfc
    out_ref,     # (N, OUT_PAD)
    *,
    n_tok,
):
    x = x_ref[...]                  # (N, H)
    bias = bias_ref[...]            # (N, N)
    hmask = hmask_ref[...]          # (NH*N, H)

    for l in range(NUM_LAYERS):
        w = wslab_ref[l]            # (H, 384)
        vec = vslab_ref[l]          # (8, 128)

        wqkv = w[:, _W_QKV:_W_O]    # (H, 3H)   Q columns already scaled
        wo = w[:, _W_O:_W_1]        # (H, H)
        w1 = w[:, _W_1:_W_2T]       # (H, 4H)
        w2t = w[:, _W_2T:_W_END]    # (H, 4H)   == W2^T

        bqkv = vec[0:1, :3 * HIDDEN_DIM]
        b1 = vec[1:2, :FFN_DIM]
        bo = vec[2:3, 0:HIDDEN_DIM]
        ln1_g = vec[2:3, HIDDEN_DIM:2 * HIDDEN_DIM]
        ln1_b = vec[2:3, 2 * HIDDEN_DIM:3 * HIDDEN_DIM]
        b2 = vec[2:3, 3 * HIDDEN_DIM:4 * HIDDEN_DIM]
        ln2_g = vec[3:4, 0:HIDDEN_DIM]
        ln2_b = vec[3:4, HIDDEN_DIM:2 * HIDDEN_DIM]

        # ----- fused QKV projection (one matmul for the whole slab) -----
        qkv = jnp.dot(x, wqkv, preferred_element_type=jnp.float32) + bqkv
        q = qkv[:, :HIDDEN_DIM]                              # pre-scaled
        k = qkv[:, HIDDEN_DIM:2 * HIDDEN_DIM]
        v = qkv[:, 2 * HIDDEN_DIM:3 * HIDDEN_DIM]

        # ----- block-diagonal batched attention (all heads & sequences) -----
        k_rep = jnp.concatenate([k] * NUM_HEADS, axis=0)     # (NH*N, H)
        v_rep = jnp.concatenate([v] * NUM_HEADS, axis=0)     # (NH*N, H)
        k_blk = hmask * k_rep
        v_blk = hmask * v_rep

        # scores[(b,s), h*N + (b',s')] = q_h(b,s) . k_h(b',s')
        s = jax.lax.dot_general(q, k_blk, (((1,), (1,)), ((), ())),
                                preferred_element_type=jnp.float32)  # (N, NH*N)

        # per-head bias add + per-head max shift (robust softmax shift)
        e_parts = []
        for h in range(NUM_HEADS):
            sh = s[:, h * n_tok:(h + 1) * n_tok] + bias
            mh = jnp.max(sh, axis=-1, keepdims=True)
            e_parts.append(jnp.exp(sh - mh))
        e = jnp.concatenate(e_parts, axis=-1)                # (N, NH*N)

        # un-normalised context; per-head denominators broadcast to columns
        ctx_un = jnp.dot(e, v_blk, preferred_element_type=jnp.float32)  # (N, H)
        denom = jnp.dot(e, hmask, preferred_element_type=jnp.float32)   # (N, H)
        ctx = ctx_un * pl.reciprocal(denom, approx=True)

        attn_out = jnp.dot(ctx, wo, preferred_element_type=jnp.float32) + bo

        # ----- residual + LayerNorm 1 -----
        x = _layernorm(x + attn_out, ln1_g, ln1_b)

        # ----- FFN -----
        hid = jnp.maximum(
            jnp.dot(x, w1, preferred_element_type=jnp.float32) + b1, 0.0)
        ffn = jax.lax.dot_general(hid, w2t, (((1,), (1,)), ((), ())),
                                  preferred_element_type=jnp.float32) + b2

        # ----- residual + LayerNorm 2 -----
        x = _layernorm(x + ffn, ln2_g, ln2_b)

    # ----- final LayerNorm (affine folded into LM head) + MLM head -----
    mu = jnp.mean(x, axis=-1, keepdims=True)
    var = jnp.mean((x - mu) ** 2, axis=-1, keepdims=True)
    xhat = (x - mu) * jax.lax.rsqrt(var + LN_EPS)

    wfc = fc_ref[0:HIDDEN_DIM, :]                            # (H, 128)
    bfc = fc_ref[HIDDEN_DIM:HIDDEN_DIM + 1, :]               # (1, 128)
    logits = jnp.dot(xhat, wfc, preferred_element_type=jnp.float32) + bfc
    out_ref[...] = logits.astype(out_ref.dtype)


# --------------------- one-time parameter packing (hoisted) ------------------
def prepare_params(params, n_tok):
    """Pack model params into the kernel's input slabs. Run ONCE, not per call."""
    scale = 1.0 / (HEAD_DIM ** 0.5)

    # permute torch per-head-interleaved [q_h|k_h|v_h] columns -> head-major [Q|K|V]
    d = np.arange(HEAD_DIM)
    h = np.arange(NUM_HEADS)
    idx_q = (h[:, None] * 3 * HEAD_DIM + d[None, :]).reshape(-1)
    perm = np.concatenate([idx_q, idx_q + HEAD_DIM, idx_q + 2 * HEAD_DIM])

    wqkv_p = params["wqkv"][:, :, perm]
    bqkv_p = params["bqkv"][:, perm]
    # fold the 1/sqrt(head_dim) attention scale into the Q columns
    col_scale = jnp.concatenate(
        [jnp.full((HIDDEN_DIM,), scale, jnp.float32),
         jnp.ones((2 * HIDDEN_DIM,), jnp.float32)])
    wqkv_p = wqkv_p * col_scale[None, None, :]
    bqkv_p = bqkv_p * col_scale[None, :]

    # weight slab: [wqkv | wo | w1 | w2^T]  -> (L, H, 384), lane dense
    w2t = jnp.transpose(params["w2"], (0, 2, 1))             # (L, H, 4H)
    wslab = jnp.concatenate([wqkv_p, params["wo"], params["w1"], w2t], axis=-1)

    # per-layer vector slab -> (L, 8, 128), lane dense
    row0 = jnp.pad(bqkv_p, ((0, 0), (0, OUT_PAD - 3 * HIDDEN_DIM)))
    row1 = params["b1"]
    row2 = jnp.concatenate([params["bo"], params["ln1_g"],
                            params["ln1_b"], params["b2"]], axis=-1)
    row3 = jnp.pad(jnp.concatenate([params["ln2_g"], params["ln2_b"]], axis=-1),
                   ((0, 0), (0, OUT_PAD - 2 * HIDDEN_DIM)))
    vslab = jnp.stack([row0, row1, row2, row3], axis=1)      # (L, 4, 128)
    vslab = jnp.pad(vslab, ((0, 0), (0, 4), (0, 0)))         # (L, 8, 128)

    # LM head: fold final-LN affine into wfc/bfc, pad to 128 lanes
    lnf_g = params["lnf_g"][0]
    lnf_b = params["lnf_b"][0]
    wfc_f = lnf_g[:, None] * params["wfc"]                   # (H, V)
    bfc_f = params["bfc"][0] + lnf_b @ params["wfc"]         # (V,)
    padv = OUT_PAD - VOCAB_SIZE
    fc_slab = jnp.concatenate(
        [jnp.pad(wfc_f, ((0, 0), (0, padv))),
         jnp.pad(bfc_f, (0, padv))[None, :],
         jnp.zeros((7, OUT_PAD), jnp.float32)], axis=0)      # (40, 128)

    # head block-diagonal selector: hmask[h*N + t, c] = 1 iff c // HEAD_DIM == h
    row_h = np.arange(NUM_HEADS * n_tok) // n_tok
    col_h = np.arange(HIDDEN_DIM) // HEAD_DIM
    hmask = jnp.asarray((row_h[:, None] == col_h[None, :]).astype(np.float32))

    return {
        "tok_emb": params["tok_emb"].astype(jnp.float32),
        "pos_emb": params["pos_emb"].astype(jnp.float32),
        "hmask": hmask,
        "wslab": wslab.astype(jnp.float32),
        "vslab": vslab.astype(jnp.float32),
        "fc": fc_slab.astype(jnp.float32),
    }


# ------------------------------ wrapper --------------------------------------
def _full_spec(shape):
    return pl.BlockSpec(shape, lambda i, n=len(shape): (0,) * n)


@jax.jit
def simple_mlm_forward(input_ids, attention_mask, prepped):
    B, S = input_ids.shape
    N = B * S

    # Glue: embedding + position embedding gathers in plain JAX.
    positions = jnp.arange(S)
    x = prepped["tok_emb"][input_ids] + prepped["pos_emb"][positions][None, :, :]
    x = x.reshape(N, HIDDEN_DIM).astype(jnp.float32)

    # Per-call additive attention bias: allow only same-sequence, unmasked keys.
    key_mask = attention_mask.astype(jnp.float32).reshape(N)
    batch_id = jnp.arange(N) // S
    allow = (batch_id[:, None] == batch_id[None, :]) & (key_mask[None, :] > 0.0)
    bias = jnp.where(allow, 0.0, NEG_BIG).astype(jnp.float32)    # (N, N)

    args = (x, bias, prepped["hmask"], prepped["wslab"], prepped["vslab"],
            prepped["fc"])

    out = pl.pallas_call(
        functools.partial(mlm_kernel, n_tok=N),
        out_shape=jax.ShapeDtypeStruct((N, OUT_PAD), jnp.float32),
        grid_spec=pltpu.PrefetchScalarGridSpec(
            num_scalar_prefetch=0,
            grid=(1,),                                    # single step: whole batch
            in_specs=[_full_spec(a.shape) for a in args],
            out_specs=_full_spec((N, OUT_PAD)),
        ),
        compiler_params=pltpu.CompilerParams(
            dimension_semantics=("arbitrary",),
        ),
    )(*args)

    return out.reshape(B, S, OUT_PAD)[:, :, :VOCAB_SIZE]


# -------------------------- pure-JAX reference --------------------------------
def simple_mlm_reference(input_ids, attention_mask, params):
    B, S = input_ids.shape
    positions = jnp.arange(S)
    x = params["tok_emb"][input_ids] + params["pos_emb"][positions][None, :, :]
    x = x.astype(jnp.float32)
    mask = attention_mask.astype(jnp.float32)

    for l in range(NUM_LAYERS):
        qkv = x @ params["wqkv"][l] + params["bqkv"][l]              # (B,S,3H)
        qkv = qkv.reshape(B, S, NUM_HEADS, 3 * HEAD_DIM)
        q, k, v = jnp.split(qkv, 3, axis=-1)
        q, k, v = (t.transpose(0, 2, 1, 3) for t in (q, k, v))       # (B,nh,S,hd)
        scores = jnp.einsum("bhqd,bhkd->bhqk", q, k) / (HEAD_DIM ** 0.5)
        scores = jnp.where(mask[:, None, None, :] == 0.0, -jnp.inf, scores)
        p = jax.nn.softmax(scores, axis=-1)
        ctx = jnp.einsum("bhqk,bhkd->bhqd", p, v)
        ctx = ctx.transpose(0, 2, 1, 3).reshape(B, S, HIDDEN_DIM)
        attn_out = ctx @ params["wo"][l] + params["bo"][l]
        x = _layernorm(x + attn_out, params["ln1_g"][l], params["ln1_b"][l])
        h = jnp.maximum(x @ params["w1"][l] + params["b1"][l], 0.0)
        ffn = h @ params["w2"][l] + params["b2"][l]
        x = _layernorm(x + ffn, params["ln2_g"][l], params["ln2_b"][l])

    x = _layernorm(x, params["lnf_g"][0], params["lnf_b"][0])
    return x @ params["wfc"] + params["bfc"][0]


# ------------------------------ param init ------------------------------------
def init_params(key):
    ks = jax.random.split(key, 20)
    scale = 0.05
    p = {
        "tok_emb": scale * jax.random.normal(ks[0], (VOCAB_SIZE, HIDDEN_DIM), jnp.float32),
        "pos_emb": scale * jax.random.normal(ks[1], (MAX_LENGTH, HIDDEN_DIM), jnp.float32),
        # linear weights stored as (in, out): y = x @ W + b (same math as torch)
        "wqkv": scale * jax.random.normal(ks[2], (NUM_LAYERS, HIDDEN_DIM, 3 * HIDDEN_DIM), jnp.float32),
        "bqkv": scale * jax.random.normal(ks[3], (NUM_LAYERS, 3 * HIDDEN_DIM), jnp.float32),
        "wo": scale * jax.random.normal(ks[4], (NUM_LAYERS, HIDDEN_DIM, HIDDEN_DIM), jnp.float32),
        "bo": scale * jax.random.normal(ks[5], (NUM_LAYERS, HIDDEN_DIM), jnp.float32),
        "w1": scale * jax.random.normal(ks[6], (NUM_LAYERS, HIDDEN_DIM, FFN_DIM), jnp.float32),
        "b1": scale * jax.random.normal(ks[7], (NUM_LAYERS, FFN_DIM), jnp.float32),
        "w2": scale * jax.random.normal(ks[8], (NUM_LAYERS, FFN_DIM, HIDDEN_DIM), jnp.float32),
        "b2": scale * jax.random.normal(ks[9], (NUM_LAYERS, HIDDEN_DIM), jnp.float32),
        "wfc": scale * jax.random.normal(ks[10], (HIDDEN_DIM, VOCAB_SIZE), jnp.float32),
        "bfc": scale * jax.random.normal(ks[11], (1, VOCAB_SIZE), jnp.float32),
        # LayerNorm affines slightly perturbed from the torch defaults so the
        # packing / folding paths are actually exercised by the check.
        "ln1_g": 1.0 + 0.1 * jax.random.normal(ks[12], (NUM_LAYERS, HIDDEN_DIM), jnp.float32),
        "ln1_b": 0.1 * jax.random.normal(ks[13], (NUM_LAYERS, HIDDEN_DIM), jnp.float32),
        "ln2_g": 1.0 + 0.1 * jax.random.normal(ks[14], (NUM_LAYERS, HIDDEN_DIM), jnp.float32),
        "ln2_b": 0.1 * jax.random.normal(ks[15], (NUM_LAYERS, HIDDEN_DIM), jnp.float32),
        "lnf_g": 1.0 + 0.1 * jax.random.normal(ks[16], (1, HIDDEN_DIM), jnp.float32),
        "lnf_b": 0.1 * jax.random.normal(ks[17], (1, HIDDEN_DIM), jnp.float32),
    }
    return p


# ---------------------------------- main ---------------------------------------
if __name__ == "__main__":
    key = jax.random.PRNGKey(0)
    k_param, k_ids = jax.random.split(key)
    params = init_params(k_param)
    prepped = prepare_params(params, BATCH * SEQ)   # one-time packing (not per call)

    input_ids = jax.random.randint(k_ids, (BATCH, SEQ), 0, VOCAB_SIZE, dtype=jnp.int32)
    attention_mask = jnp.ones((BATCH, SEQ), dtype=jnp.float32)

    logits = simple_mlm_forward(input_ids, attention_mask, prepped)
    logits = jax.block_until_ready(logits)

    ref = simple_mlm_reference(input_ids, attention_mask, params)
    # small headroom for the approx-reciprocal softmax normalization
    np.testing.assert_allclose(np.asarray(logits), np.asarray(ref),
                               rtol=2e-3, atol=2e-3)

    print("KERNEL_OK")
</pallas_src>

<mosaic_0001>
module attributes {stable_mosaic.version = 11 : i64} {
  func.func @mlm_kernel(%arg0: i32, %arg1: memref<16x32xf32, #tpu.memory_space<vmem>>, %arg2: memref<16x16xf32, #tpu.memory_space<vmem>>, %arg3: memref<64x32xf32, #tpu.memory_space<vmem>>, %arg4: memref<2x32x384xf32, #tpu.memory_space<vmem>>, %arg5: memref<2x8x128xf32, #tpu.memory_space<vmem>>, %arg6: memref<40x128xf32, #tpu.memory_space<vmem>>, %arg7: memref<16x128xf32, #tpu.memory_space<vmem>>) attributes {dimension_semantics = [#tpu.dimension_semantics<arbitrary>], iteration_bounds = array<i64: 1>, scalar_prefetch = 0 : i64, scratch_operands = 0 : i64, tpu.core_type = #tpu.core_type<tc>, window_params = [{pipeline_mode = #tpu.pipeline_mode<synchronous>, transform_indices = @transform_0, window_bounds = array<i64: 16, 32>}, {pipeline_mode = #tpu.pipeline_mode<synchronous>, transform_indices = @transform_1, window_bounds = array<i64: 16, 16>}, {pipeline_mode = #tpu.pipeline_mode<synchronous>, transform_indices = @transform_2, window_bounds = array<i64: 64, 32>}, {pipeline_mode = #tpu.pipeline_mode<synchronous>, transform_indices = @transform_3, window_bounds = array<i64: 2, 32, 384>}, {pipeline_mode = #tpu.pipeline_mode<synchronous>, transform_indices = @transform_4, window_bounds = array<i64: 2, 8, 128>}, {pipeline_mode = #tpu.pipeline_mode<synchronous>, transform_indices = @transform_5, window_bounds = array<i64: 40, 128>}, {pipeline_mode = #tpu.pipeline_mode<synchronous>, transform_indices = @transform_6, window_bounds = array<i64: 16, 128>}]} {
    %c0 = arith.constant 0 : index
    %c0_0 = arith.constant 0 : index
    %0 = vector.load %arg1[%c0, %c0_0] : memref<16x32xf32, #tpu.memory_space<vmem>>, vector<16x32xf32>
    %c0_1 = arith.constant 0 : index
    %c0_2 = arith.constant 0 : index
    %1 = vector.load %arg2[%c0_1, %c0_2] : memref<16x16xf32, #tpu.memory_space<vmem>>, vector<16x16xf32>
    %c0_3 = arith.constant 0 : index
    %c0_4 = arith.constant 0 : index
    %2 = vector.load %arg3[%c0_3, %c0_4] : memref<64x32xf32, #tpu.memory_space<vmem>>, vector<64x32xf32>
    %c0_5 = arith.constant 0 : index
    %c0_6 = arith.constant 0 : index
    %c0_7 = arith.constant 0 : index
    %3 = vector.load %arg4[%c0_5, %c0_6, %c0_7] : memref<2x32x384xf32, #tpu.memory_space<vmem>>, vector<1x32x384xf32>
    %4 = vector.shape_cast %3 : vector<1x32x384xf32> to vector<32x384xf32>
    %c0_8 = arith.constant 0 : index
    %c0_9 = arith.constant 0 : index
    %c0_10 = arith.constant 0 : index
    %5 = vector.load %arg5[%c0_8, %c0_9, %c0_10] : memref<2x8x128xf32, #tpu.memory_space<vmem>>, vector<1x8x128xf32>
    %6 = vector.shape_cast %5 : vector<1x8x128xf32> to vector<8x128xf32>
    %7 = vector.extract_strided_slice %4 {offsets = [0, 0], sizes = [32, 96], strides = [1, 1]} : vector<32x384xf32> to vector<32x96xf32>
    %8 = vector.extract_strided_slice %4 {offsets = [0, 96], sizes = [32, 32], strides = [1, 1]} : vector<32x384xf32> to vector<32x32xf32>
    %9 = vector.extract_strided_slice %4 {offsets = [0, 128], sizes = [32, 128], strides = [1, 1]} : vector<32x384xf32> to vector<32x128xf32>
    %10 = vector.extract_strided_slice %4 {offsets = [0, 256], sizes = [32, 128], strides = [1, 1]} : vector<32x384xf32> to vector<32x128xf32>
    %11 = vector.extract_strided_slice %6 {offsets = [0, 0], sizes = [1, 96], strides = [1, 1]} : vector<8x128xf32> to vector<1x96xf32>
    %12 = vector.extract_strided_slice %6 {offsets = [1, 0], sizes = [1, 128], strides = [1, 1]} : vector<8x128xf32> to vector<1x128xf32>
    %13 = vector.extract_strided_slice %6 {offsets = [2, 0], sizes = [1, 32], strides = [1, 1]} : vector<8x128xf32> to vector<1x32xf32>
    %14 = vector.extract_strided_slice %6 {offsets = [2, 32], sizes = [1, 32], strides = [1, 1]} : vector<8x128xf32> to vector<1x32xf32>
    %15 = vector.extract_strided_slice %6 {offsets = [2, 64], sizes = [1, 32], strides = [1, 1]} : vector<8x128xf32> to vector<1x32xf32>
    %16 = vector.extract_strided_slice %6 {offsets = [2, 96], sizes = [1, 32], strides = [1, 1]} : vector<8x128xf32> to vector<1x32xf32>
    %17 = vector.extract_strided_slice %6 {offsets = [3, 0], sizes = [1, 32], strides = [1, 1]} : vector<8x128xf32> to vector<1x32xf32>
    %18 = vector.extract_strided_slice %6 {offsets = [3, 32], sizes = [1, 32], strides = [1, 1]} : vector<8x128xf32> to vector<1x32xf32>
    %cst = arith.constant dense<0.000000e+00> : vector<16x96xf32>
    %19 = tpu.matmul %0, %7, %cst {dimension_numbers = #tpu.dot_dimension_numbers<[1], [0], [0], [1], [0, 0, 1, 1], [], []>} : vector<16x32xf32>, vector<32x96xf32>, vector<16x96xf32> -> vector<16x96xf32>
    %20 = vector.broadcast %11 : vector<1x96xf32> to vector<16x96xf32>
    %21 = arith.addf %19, %20 : vector<16x96xf32>
    %22 = vector.extract_strided_slice %21 {offsets = [0, 0], sizes = [16, 32], strides = [1, 1]} : vector<16x96xf32> to vector<16x32xf32>
    %23 = vector.extract_strided_slice %21 {offsets = [0, 32], sizes = [16, 32], strides = [1, 1]} : vector<16x96xf32> to vector<16x32xf32>
    %24 = vector.extract_strided_slice %21 {offsets = [0, 64], sizes = [16, 32], strides = [1, 1]} : vector<16x96xf32> to vector<16x32xf32>
    %25 = tpu.concatenate %23, %23, %23, %23 in 0 : vector<16x32xf32>, vector<16x32xf32>, vector<16x32xf32>, vector<16x32xf32> -> vector<64x32xf32>
    %26 = tpu.concatenate %24, %24, %24, %24 in 0 : vector<16x32xf32>, vector<16x32xf32>, vector<16x32xf32>, vector<16x32xf32> -> vector<64x32xf32>
    %27 = arith.mulf %2, %25 : vector<64x32xf32>
    %28 = arith.mulf %2, %26 : vector<64x32xf32>
    %cst_11 = arith.constant dense<0.000000e+00> : vector<16x64xf32>
    %29 = tpu.matmul %22, %27, %cst_11 {dimension_numbers = #tpu.dot_dimension_numbers<[1], [1], [0], [0], [0, 0, 1, 0], [], []>} : vector<16x32xf32>, vector<64x32xf32>, vector<16x64xf32> -> vector<16x64xf32>
    %30 = vector.extract_strided_slice %29 {offsets = [0, 0], sizes = [16, 16], strides = [1, 1]} : vector<16x64xf32> to vector<16x16xf32>
    %31 = arith.addf %30, %1 : vector<16x16xf32>
    %cst_12 = arith.constant dense<0xFF800000> : vector<16xf32>
    %32 = vector.multi_reduction <maximumf>, %31, %cst_12 [1] : vector<16x16xf32> to vector<16xf32>
    %33 = vector.shape_cast %32 : vector<16xf32> to vector<16x1xf32>
    %34 = vector.broadcast %33 : vector<16x1xf32> to vector<16x16xf32>
    %35 = arith.subf %31, %34 : vector<16x16xf32>
    %36 = math.exp %35 : vector<16x16xf32>
    %37 = vector.extract_strided_slice %29 {offsets = [0, 16], sizes = [16, 16], strides = [1, 1]} : vector<16x64xf32> to vector<16x16xf32>
    %38 = arith.addf %37, %1 : vector<16x16xf32>
    %cst_13 = arith.constant dense<0xFF800000> : vector<16xf32>
    %39 = vector.multi_reduction <maximumf>, %38, %cst_13 [1] : vector<16x16xf32> to vector<16xf32>
    %40 = vector.shape_cast %39 : vector<16xf32> to vector<16x1xf32>
    %41 = vector.broadcast %40 : vector<16x1xf32> to vector<16x16xf32>
    %42 = arith.subf %38, %41 : vector<16x16xf32>
    %43 = math.exp %42 : vector<16x16xf32>
    %44 = vector.extract_strided_slice %29 {offsets = [0, 32], sizes = [16, 16], strides = [1, 1]} : vector<16x64xf32> to vector<16x16xf32>
    %45 = arith.addf %44, %1 : vector<16x16xf32>
    %cst_14 = arith.constant dense<0xFF800000> : vector<16xf32>
    %46 = vector.multi_reduction <maximumf>, %45, %cst_14 [1] : vector<16x16xf32> to vector<16xf32>
    %47 = vector.shape_cast %46 : vector<16xf32> to vector<16x1xf32>
    %48 = vector.broadcast %47 : vector<16x1xf32> to vector<16x16xf32>
    %49 = arith.subf %45, %48 : vector<16x16xf32>
    %50 = math.exp %49 : vector<16x16xf32>
    %51 = vector.extract_strided_slice %29 {offsets = [0, 48], sizes = [16, 16], strides = [1, 1]} : vector<16x64xf32> to vector<16x16xf32>
    %52 = arith.addf %51, %1 : vector<16x16xf32>
    %cst_15 = arith.constant dense<0xFF800000> : vector<16xf32>
    %53 = vector.multi_reduction <maximumf>, %52, %cst_15 [1] : vector<16x16xf32> to vector<16xf32>
    %54 = vector.shape_cast %53 : vector<16xf32> to vector<16x1xf32>
    %55 = vector.broadcast %54 : vector<16x1xf32> to vector<16x16xf32>
    %56 = arith.subf %52, %55 : vector<16x16xf32>
    %57 = math.exp %56 : vector<16x16xf32>
    %58 = tpu.concatenate %36, %43, %50, %57 in 1 : vector<16x16xf32>, vector<16x16xf32>, vector<16x16xf32>, vector<16x16xf32> -> vector<16x64xf32>
    %cst_16 = arith.constant dense<0.000000e+00> : vector<16x32xf32>
    %59 = tpu.matmul %58, %28, %cst_16 {dimension_numbers = #tpu.dot_dimension_numbers<[1], [0], [0], [1], [0, 0, 1, 1], [], []>} : vector<16x64xf32>, vector<64x32xf32>, vector<16x32xf32> -> vector<16x32xf32>
    %cst_17 = arith.constant dense<0.000000e+00> : vector<16x32xf32>
    %60 = tpu.matmul %58, %2, %cst_17 {dimension_numbers = #tpu.dot_dimension_numbers<[1], [0], [0], [1], [0, 0, 1, 1], [], []>} : vector<16x64xf32>, vector<64x32xf32>, vector<16x32xf32> -> vector<16x32xf32>
    %61 = tpu.reciprocal %60 {approx = true} : vector<16x32xf32> -> vector<16x32xf32>
    %62 = arith.mulf %59, %61 : vector<16x32xf32>
    %cst_18 = arith.constant dense<0.000000e+00> : vector<16x32xf32>
    %63 = tpu.matmul %62, %8, %cst_18 {dimension_numbers = #tpu.dot_dimension_numbers<[1], [0], [0], [1], [0, 0, 1, 1], [], []>} : vector<16x32xf32>, vector<32x32xf32>, vector<16x32xf32> -> vector<16x32xf32>
    %64 = vector.broadcast %13 : vector<1x32xf32> to vector<16x32xf32>
    %65 = arith.addf %63, %64 : vector<16x32xf32>
    %66 = arith.addf %0, %65 : vector<16x32xf32>
    %cst_19 = arith.constant dense<0.000000e+00> : vector<16xf32>
    %67 = vector.multi_reduction <add>, %66, %cst_19 [1] : vector<16x32xf32> to vector<16xf32>
    %68 = vector.shape_cast %67 : vector<16xf32> to vector<16x1xf32>
    %cst_20 = arith.constant 3.200000e+01 : f32
    %69 = vector.broadcast %cst_20 : f32 to vector<16x1xf32>
    %70 = arith.divf %68, %69 : vector<16x1xf32>
    %71 = vector.broadcast %70 : vector<16x1xf32> to vector<16x32xf32>
    %72 = arith.subf %66, %71 : vector<16x32xf32>
    %73 = arith.mulf %72, %72 : vector<16x32xf32>
    %cst_21 = arith.constant dense<0.000000e+00> : vector<16xf32>
    %74 = vector.multi_reduction <add>, %73, %cst_21 [1] : vector<16x32xf32> to vector<16xf32>
    %75 = vector.shape_cast %74 : vector<16xf32> to vector<16x1xf32>
    %cst_22 = arith.constant 3.200000e+01 : f32
    %76 = vector.broadcast %cst_22 : f32 to vector<16x1xf32>
    %77 = arith.divf %75, %76 : vector<16x1xf32>
    %78 = vector.broadcast %70 : vector<16x1xf32> to vector<16x32xf32>
    %79 = arith.subf %66, %78 : vector<16x32xf32>
    %cst_23 = arith.constant 9.99999974E-6 : f32
    %80 = vector.broadcast %cst_23 : f32 to vector<16x1xf32>
    %81 = arith.addf %77, %80 : vector<16x1xf32>
    %82 = math.rsqrt %81 : vector<16x1xf32>
    %83 = vector.broadcast %82 : vector<16x1xf32> to vector<16x32xf32>
    %84 = arith.mulf %79, %83 : vector<16x32xf32>
    %85 = vector.broadcast %14 : vector<1x32xf32> to vector<16x32xf32>
    %86 = arith.mulf %84, %85 : vector<16x32xf32>
    %87 = vector.broadcast %15 : vector<1x32xf32> to vector<16x32xf32>
    %88 = arith.addf %86, %87 : vector<16x32xf32>
    %cst_24 = arith.constant dense<0.000000e+00> : vector<16x128xf32>
    %89 = tpu.matmul %88, %9, %cst_24 {dimension_numbers = #tpu.dot_dimension_numbers<[1], [0], [0], [1], [0, 0, 1, 1], [], []>} : vector<16x32xf32>, vector<32x128xf32>, vector<16x128xf32> -> vector<16x128xf32>
    %90 = vector.broadcast %12 : vector<1x128xf32> to vector<16x128xf32>
    %91 = arith.addf %89, %90 : vector<16x128xf32>
    %cst_25 = arith.constant 0.000000e+00 : f32
    %92 = vector.broadcast %cst_25 : f32 to vector<16x128xf32>
    %93 = arith.maximumf %91, %92 : vector<16x128xf32>
    %cst_26 = arith.constant dense<0.000000e+00> : vector<16x32xf32>
    %94 = tpu.matmul %93, %10, %cst_26 {dimension_numbers = #tpu.dot_dimension_numbers<[1], [1], [0], [0], [0, 0, 1, 0], [], []>} : vector<16x128xf32>, vector<32x128xf32>, vector<16x32xf32> -> vector<16x32xf32>
    %95 = vector.broadcast %16 : vector<1x32xf32> to vector<16x32xf32>
    %96 = arith.addf %94, %95 : vector<16x32xf32>
    %97 = arith.addf %88, %96 : vector<16x32xf32>
    %cst_27 = arith.constant dense<0.000000e+00> : vector<16xf32>
    %98 = vector.multi_reduction <add>, %97, %cst_27 [1] : vector<16x32xf32> to vector<16xf32>
    %99 = vector.shape_cast %98 : vector<16xf32> to vector<16x1xf32>
    %cst_28 = arith.constant 3.200000e+01 : f32
    %100 = vector.broadcast %cst_28 : f32 to vector<16x1xf32>
    %101 = arith.divf %99, %100 : vector<16x1xf32>
    %102 = vector.broadcast %101 : vector<16x1xf32> to vector<16x32xf32>
    %103 = arith.subf %97, %102 : vector<16x32xf32>
    %104 = arith.mulf %103, %103 : vector<16x32xf32>
    %cst_29 = arith.constant dense<0.000000e+00> : vector<16xf32>
    %105 = vector.multi_reduction <add>, %104, %cst_29 [1] : vector<16x32xf32> to vector<16xf32>
    %106 = vector.shape_cast %105 : vector<16xf32> to vector<16x1xf32>
    %cst_30 = arith.constant 3.200000e+01 : f32
    %107 = vector.broadcast %cst_30 : f32 to vector<16x1xf32>
    %108 = arith.divf %106, %107 : vector<16x1xf32>
    %109 = vector.broadcast %101 : vector<16x1xf32> to vector<16x32xf32>
    %110 = arith.subf %97, %109 : vector<16x32xf32>
    %cst_31 = arith.constant 9.99999974E-6 : f32
    %111 = vector.broadcast %cst_31 : f32 to vector<16x1xf32>
    %112 = arith.addf %108, %111 : vector<16x1xf32>
    %113 = math.rsqrt %112 : vector<16x1xf32>
    %114 = vector.broadcast %113 : vector<16x1xf32> to vector<16x32xf32>
    %115 = arith.mulf %110, %114 : vector<16x32xf32>
    %116 = vector.broadcast %17 : vector<1x32xf32> to vector<16x32xf32>
    %117 = arith.mulf %115, %116 : vector<16x32xf32>
    %118 = vector.broadcast %18 : vector<1x32xf32> to vector<16x32xf32>
    %119 = arith.addf %117, %118 : vector<16x32xf32>
    %c1 = arith.constant 1 : index
    %c0_32 = arith.constant 0 : index
    %c0_33 = arith.constant 0 : index
    %120 = vector.load %arg4[%c1, %c0_32, %c0_33] : memref<2x32x384xf32, #tpu.memory_space<vmem>>, vector<1x32x384xf32>
    %121 = vector.shape_cast %120 : vector<1x32x384xf32> to vector<32x384xf32>
    %c1_34 = arith.constant 1 : index
    %c0_35 = arith.constant 0 : index
    %c0_36 = arith.constant 0 : index
    %122 = vector.load %arg5[%c1_34, %c0_35, %c0_36] : memref<2x8x128xf32, #tpu.memory_space<vmem>>, vector<1x8x128xf32>
    %123 = vector.shape_cast %122 : vector<1x8x128xf32> to vector<8x128xf32>
    %124 = vector.extract_strided_slice %121 {offsets = [0, 0], sizes = [32, 96], strides = [1, 1]} : vector<32x384xf32> to vector<32x96xf32>
    %125 = vector.extract_strided_slice %121 {offsets = [0, 96], sizes = [32, 32], strides = [1, 1]} : vector<32x384xf32> to vector<32x32xf32>
    %126 = vector.extract_strided_slice %121 {offsets = [0, 128], sizes = [32, 128], strides = [1, 1]} : vector<32x384xf32> to vector<32x128xf32>
    %127 = vector.extract_strided_slice %121 {offsets = [0, 256], sizes = [32, 128], strides = [1, 1]} : vector<32x384xf32> to vector<32x128xf32>
    %128 = vector.extract_strided_slice %123 {offsets = [0, 0], sizes = [1, 96], strides = [1, 1]} : vector<8x128xf32> to vector<1x96xf32>
    %129 = vector.extract_strided_slice %123 {offsets = [1, 0], sizes = [1, 128], strides = [1, 1]} : vector<8x128xf32> to vector<1x128xf32>
    %130 = vector.extract_strided_slice %123 {offsets = [2, 0], sizes = [1, 32], strides = [1, 1]} : vector<8x128xf32> to vector<1x32xf32>
    %131 = vector.extract_strided_slice %123 {offsets = [2, 32], sizes = [1, 32], strides = [1, 1]} : vector<8x128xf32> to vector<1x32xf32>
    %132 = vector.extract_strided_slice %123 {offsets = [2, 64], sizes = [1, 32], strides = [1, 1]} : vector<8x128xf32> to vector<1x32xf32>
    %133 = vector.extract_strided_slice %123 {offsets = [2, 96], sizes = [1, 32], strides = [1, 1]} : vector<8x128xf32> to vector<1x32xf32>
    %134 = vector.extract_strided_slice %123 {offsets = [3, 0], sizes = [1, 32], strides = [1, 1]} : vector<8x128xf32> to vector<1x32xf32>
    %135 = vector.extract_strided_slice %123 {offsets = [3, 32], sizes = [1, 32], strides = [1, 1]} : vector<8x128xf32> to vector<1x32xf32>
    %cst_37 = arith.constant dense<0.000000e+00> : vector<16x96xf32>
    %136 = tpu.matmul %119, %124, %cst_37 {dimension_numbers = #tpu.dot_dimension_numbers<[1], [0], [0], [1], [0, 0, 1, 1], [], []>} : vector<16x32xf32>, vector<32x96xf32>, vector<16x96xf32> -> vector<16x96xf32>
    %137 = vector.broadcast %128 : vector<1x96xf32> to vector<16x96xf32>
    %138 = arith.addf %136, %137 : vector<16x96xf32>
    %139 = vector.extract_strided_slice %138 {offsets = [0, 0], sizes = [16, 32], strides = [1, 1]} : vector<16x96xf32> to vector<16x32xf32>
    %140 = vector.extract_strided_slice %138 {offsets = [0, 32], sizes = [16, 32], strides = [1, 1]} : vector<16x96xf32> to vector<16x32xf32>
    %141 = vector.extract_strided_slice %138 {offsets = [0, 64], sizes = [16, 32], strides = [1, 1]} : vector<16x96xf32> to vector<16x32xf32>
    %142 = tpu.concatenate %140, %140, %140, %140 in 0 : vector<16x32xf32>, vector<16x32xf32>, vector<16x32xf32>, vector<16x32xf32> -> vector<64x32xf32>
    %143 = tpu.concatenate %141, %141, %141, %141 in 0 : vector<16x32xf32>, vector<16x32xf32>, vector<16x32xf32>, vector<16x32xf32> -> vector<64x32xf32>
    %144 = arith.mulf %2, %142 : vector<64x32xf32>
    %145 = arith.mulf %2, %143 : vector<64x32xf32>
    %cst_38 = arith.constant dense<0.000000e+00> : vector<16x64xf32>
    %146 = tpu.matmul %139, %144, %cst_38 {dimension_numbers = #tpu.dot_dimension_numbers<[1], [1], [0], [0], [0, 0, 1, 0], [], []>} : vector<16x32xf32>, vector<64x32xf32>, vector<16x64xf32> -> vector<16x64xf32>
    %147 = vector.extract_strided_slice %146 {offsets = [0, 0], sizes = [16, 16], strides = [1, 1]} : vector<16x64xf32> to vector<16x16xf32>
    %148 = arith.addf %147, %1 : vector<16x16xf32>
    %cst_39 = arith.constant dense<0xFF800000> : vector<16xf32>
    %149 = vector.multi_reduction <maximumf>, %148, %cst_39 [1] : vector<16x16xf32> to vector<16xf32>
    %150 = vector.shape_cast %149 : vector<16xf32> to vector<16x1xf32>
    %151 = vector.broadcast %150 : vector<16x1xf32> to vector<16x16xf32>
    %152 = arith.subf %148, %151 : vector<16x16xf32>
    %153 = math.exp %152 : vector<16x16xf32>
    %154 = vector.extract_strided_slice %146 {offsets = [0, 16], sizes = [16, 16], strides = [1, 1]} : vector<16x64xf32> to vector<16x16xf32>
    %155 = arith.addf %154, %1 : vector<16x16xf32>
    %cst_40 = arith.constant dense<0xFF800000> : vector<16xf32>
    %156 = vector.multi_reduction <maximumf>, %155, %cst_40 [1] : vector<16x16xf32> to vector<16xf32>
    %157 = vector.shape_cast %156 : vector<16xf32> to vector<16x1xf32>
    %158 = vector.broadcast %157 : vector<16x1xf32> to vector<16x16xf32>
    %159 = arith.subf %155, %158 : vector<16x16xf32>
    %160 = math.exp %159 : vector<16x16xf32>
    %161 = vector.extract_strided_slice %146 {offsets = [0, 32], sizes = [16, 16], strides = [1, 1]} : vector<16x64xf32> to vector<16x16xf32>
    %162 = arith.addf %161, %1 : vector<16x16xf32>
    %cst_41 = arith.constant dense<0xFF800000> : vector<16xf32>
    %163 = vector.multi_reduction <maximumf>, %162, %cst_41 [1] : vector<16x16xf32> to vector<16xf32>
    %164 = vector.shape_cast %163 : vector<16xf32> to vector<16x1xf32>
    %165 = vector.broadcast %164 : vector<16x1xf32> to vector<16x16xf32>
    %166 = arith.subf %162, %165 : vector<16x16xf32>
    %167 = math.exp %166 : vector<16x16xf32>
    %168 = vector.extract_strided_slice %146 {offsets = [0, 48], sizes = [16, 16], strides = [1, 1]} : vector<16x64xf32> to vector<16x16xf32>
    %169 = arith.addf %168, %1 : vector<16x16xf32>
    %cst_42 = arith.constant dense<0xFF800000> : vector<16xf32>
    %170 = vector.multi_reduction <maximumf>, %169, %cst_42 [1] : vector<16x16xf32> to vector<16xf32>
    %171 = vector.shape_cast %170 : vector<16xf32> to vector<16x1xf32>
    %172 = vector.broadcast %171 : vector<16x1xf32> to vector<16x16xf32>
    %173 = arith.subf %169, %172 : vector<16x16xf32>
    %174 = math.exp %173 : vector<16x16xf32>
    %175 = tpu.concatenate %153, %160, %167, %174 in 1 : vector<16x16xf32>, vector<16x16xf32>, vector<16x16xf32>, vector<16x16xf32> -> vector<16x64xf32>
    %cst_43 = arith.constant dense<0.000000e+00> : vector<16x32xf32>
    %176 = tpu.matmul %175, %145, %cst_43 {dimension_numbers = #tpu.dot_dimension_numbers<[1], [0], [0], [1], [0, 0, 1, 1], [], []>} : vector<16x64xf32>, vector<64x32xf32>, vector<16x32xf32> -> vector<16x32xf32>
    %cst_44 = arith.constant dense<0.000000e+00> : vector<16x32xf32>
    %177 = tpu.matmul %175, %2, %cst_44 {dimension_numbers = #tpu.dot_dimension_numbers<[1], [0], [0], [1], [0, 0, 1, 1], [], []>} : vector<16x64xf32>, vector<64x32xf32>, vector<16x32xf32> -> vector<16x32xf32>
    %178 = tpu.reciprocal %177 {approx = true} : vector<16x32xf32> -> vector<16x32xf32>
    %179 = arith.mulf %176, %178 : vector<16x32xf32>
    %cst_45 = arith.constant dense<0.000000e+00> : vector<16x32xf32>
    %180 = tpu.matmul %179, %125, %cst_45 {dimension_numbers = #tpu.dot_dimension_numbers<[1], [0], [0], [1], [0, 0, 1, 1], [], []>} : vector<16x32xf32>, vector<32x32xf32>, vector<16x32xf32> -> vector<16x32xf32>
    %181 = vector.broadcast %130 : vector<1x32xf32> to vector<16x32xf32>
    %182 = arith.addf %180, %181 : vector<16x32xf32>
    %183 = arith.addf %119, %182 : vector<16x32xf32>
    %cst_46 = arith.constant dense<0.000000e+00> : vector<16xf32>
    %184 = vector.multi_reduction <add>, %183, %cst_46 [1] : vector<16x32xf32> to vector<16xf32>
    %185 = vector.shape_cast %184 : vector<16xf32> to vector<16x1xf32>
    %cst_47 = arith.constant 3.200000e+01 : f32
    %186 = vector.broadcast %cst_47 : f32 to vector<16x1xf32>
    %187 = arith.divf %185, %186 : vector<16x1xf32>
    %188 = vector.broadcast %187 : vector<16x1xf32> to vector<16x32xf32>
    %189 = arith.subf %183, %188 : vector<16x32xf32>
    %190 = arith.mulf %189, %189 : vector<16x32xf32>
    %cst_48 = arith.constant dense<0.000000e+00> : vector<16xf32>
    %191 = vector.multi_reduction <add>, %190, %cst_48 [1] : vector<16x32xf32> to vector<16xf32>
    %192 = vector.shape_cast %191 : vector<16xf32> to vector<16x1xf32>
    %cst_49 = arith.constant 3.200000e+01 : f32
    %193 = vector.broadcast %cst_49 : f32 to vector<16x1xf32>
    %194 = arith.divf %192, %193 : vector<16x1xf32>
    %195 = vector.broadcast %187 : vector<16x1xf32> to vector<16x32xf32>
    %196 = arith.subf %183, %195 : vector<16x32xf32>
    %cst_50 = arith.constant 9.99999974E-6 : f32
    %197 = vector.broadcast %cst_50 : f32 to vector<16x1xf32>
    %198 = arith.addf %194, %197 : vector<16x1xf32>
    %199 = math.rsqrt %198 : vector<16x1xf32>
    %200 = vector.broadcast %199 : vector<16x1xf32> to vector<16x32xf32>
    %201 = arith.mulf %196, %200 : vector<16x32xf32>
    %202 = vector.broadcast %131 : vector<1x32xf32> to vector<16x32xf32>
    %203 = arith.mulf %201, %202 : vector<16x32xf32>
    %204 = vector.broadcast %132 : vector<1x32xf32> to vector<16x32xf32>
    %205 = arith.addf %203, %204 : vector<16x32xf32>
    %cst_51 = arith.constant dense<0.000000e+00> : vector<16x128xf32>
    %206 = tpu.matmul %205, %126, %cst_51 {dimension_numbers = #tpu.dot_dimension_numbers<[1], [0], [0], [1], [0, 0, 1, 1], [], []>} : vector<16x32xf32>, vector<32x128xf32>, vector<16x128xf32> -> vector<16x128xf32>
    %207 = vector.broadcast %129 : vector<1x128xf32> to vector<16x128xf32>
    %208 = arith.addf %206, %207 : vector<16x128xf32>
    %cst_52 = arith.constant 0.000000e+00 : f32
    %209 = vector.broadcast %cst_52 : f32 to vector<16x128xf32>
    %210 = arith.maximumf %208, %209 : vector<16x128xf32>
    %cst_53 = arith.constant dense<0.000000e+00> : vector<16x32xf32>
    %211 = tpu.matmul %210, %127, %cst_53 {dimension_numbers = #tpu.dot_dimension_numbers<[1], [1], [0], [0], [0, 0, 1, 0], [], []>} : vector<16x128xf32>, vector<32x128xf32>, vector<16x32xf32> -> vector<16x32xf32>
    %212 = vector.broadcast %133 : vector<1x32xf32> to vector<16x32xf32>
    %213 = arith.addf %211, %212 : vector<16x32xf32>
    %214 = arith.addf %205, %213 : vector<16x32xf32>
    %cst_54 = arith.constant dense<0.000000e+00> : vector<16xf32>
    %215 = vector.multi_reduction <add>, %214, %cst_54 [1] : vector<16x32xf32> to vector<16xf32>
    %216 = vector.shape_cast %215 : vector<16xf32> to vector<16x1xf32>
    %cst_55 = arith.constant 3.200000e+01 : f32
    %217 = vector.broadcast %cst_55 : f32 to vector<16x1xf32>
    %218 = arith.divf %216, %217 : vector<16x1xf32>
    %219 = vector.broadcast %218 : vector<16x1xf32> to vector<16x32xf32>
    %220 = arith.subf %214, %219 : vector<16x32xf32>
    %221 = arith.mulf %220, %220 : vector<16x32xf32>
    %cst_56 = arith.constant dense<0.000000e+00> : vector<16xf32>
    %222 = vector.multi_reduction <add>, %221, %cst_56 [1] : vector<16x32xf32> to vector<16xf32>
    %223 = vector.shape_cast %222 : vector<16xf32> to vector<16x1xf32>
    %cst_57 = arith.constant 3.200000e+01 : f32
    %224 = vector.broadcast %cst_57 : f32 to vector<16x1xf32>
    %225 = arith.divf %223, %224 : vector<16x1xf32>
    %226 = vector.broadcast %218 : vector<16x1xf32> to vector<16x32xf32>
    %227 = arith.subf %214, %226 : vector<16x32xf32>
    %cst_58 = arith.constant 9.99999974E-6 : f32
    %228 = vector.broadcast %cst_58 : f32 to vector<16x1xf32>
    %229 = arith.addf %225, %228 : vector<16x1xf32>
    %230 = math.rsqrt %229 : vector<16x1xf32>
    %231 = vector.broadcast %230 : vector<16x1xf32> to vector<16x32xf32>
    %232 = arith.mulf %227, %231 : vector<16x32xf32>
    %233 = vector.broadcast %134 : vector<1x32xf32> to vector<16x32xf32>
    %234 = arith.mulf %232, %233 : vector<16x32xf32>
    %235 = vector.broadcast %135 : vector<1x32xf32> to vector<16x32xf32>
    %236 = arith.addf %234, %235 : vector<16x32xf32>
    %cst_59 = arith.constant dense<0.000000e+00> : vector<16xf32>
    %237 = vector.multi_reduction <add>, %236, %cst_59 [1] : vector<16x32xf32> to vector<16xf32>
    %238 = vector.shape_cast %237 : vector<16xf32> to vector<16x1xf32>
    %cst_60 = arith.constant 3.200000e+01 : f32
    %239 = vector.broadcast %cst_60 : f32 to vector<16x1xf32>
    %240 = arith.divf %238, %239 : vector<16x1xf32>
    %241 = vector.broadcast %240 : vector<16x1xf32> to vector<16x32xf32>
    %242 = arith.subf %236, %241 : vector<16x32xf32>
    %243 = arith.mulf %242, %242 : vector<16x32xf32>
    %cst_61 = arith.constant dense<0.000000e+00> : vector<16xf32>
    %244 = vector.multi_reduction <add>, %243, %cst_61 [1] : vector<16x32xf32> to vector<16xf32>
    %245 = vector.shape_cast %244 : vector<16xf32> to vector<16x1xf32>
    %cst_62 = arith.constant 3.200000e+01 : f32
    %246 = vector.broadcast %cst_62 : f32 to vector<16x1xf32>
    %247 = arith.divf %245, %246 : vector<16x1xf32>
    %248 = vector.broadcast %240 : vector<16x1xf32> to vector<16x32xf32>
    %249 = arith.subf %236, %248 : vector<16x32xf32>
    %cst_63 = arith.constant 9.99999974E-6 : f32
    %250 = vector.broadcast %cst_63 : f32 to vector<16x1xf32>
    %251 = arith.addf %247, %250 : vector<16x1xf32>
    %252 = math.rsqrt %251 : vector<16x1xf32>
    %253 = vector.broadcast %252 : vector<16x1xf32> to vector<16x32xf32>
    %254 = arith.mulf %249, %253 : vector<16x32xf32>
    %c0_64 = arith.constant 0 : index
    %c0_65 = arith.constant 0 : index
    %255 = vector.load %arg6[%c0_64, %c0_65] : memref<40x128xf32, #tpu.memory_space<vmem>>, vector<32x128xf32>
    %c32 = arith.constant 32 : index
    %c0_66 = arith.constant 0 : index
    %256 = vector.load %arg6[%c32, %c0_66] : memref<40x128xf32, #tpu.memory_space<vmem>>, vector<1x128xf32>
    %cst_67 = arith.constant dense<0.000000e+00> : vector<16x128xf32>
    %257 = tpu.matmul %254, %255, %cst_67 {dimension_numbers = #tpu.dot_dimension_numbers<[1], [0], [0], [1], [0, 0, 1, 1], [], []>} : vector<16x32xf32>, vector<32x128xf32>, vector<16x128xf32> -> vector<16x128xf32>
    %258 = vector.broadcast %256 : vector<1x128xf32> to vector<16x128xf32>
    %259 = arith.addf %257, %258 : vector<16x128xf32>
    %c0_68 = arith.constant 0 : index
    %c0_69 = arith.constant 0 : index
    %260 = vector.load %arg7[%c0_68, %c0_69] : memref<16x128xf32, #tpu.memory_space<vmem>>, vector<16x128xf32>
    tpu.vector_store %arg7[%c0_68, %c0_69], %259 {strides = array<i32>} : memref<16x128xf32, #tpu.memory_space<vmem>>, vector<16x128xf32>,
    return
  }
  func.func @transform_0(%arg0: i32) -> (i32, i32) {
    %c0_i32 = arith.constant 0 : i32
    %c0_i32_0 = arith.constant 0 : i32
    %c0_i32_1 = arith.constant 0 : i32
    return %c0_i32, %c0_i32_0 : i32, i32
  }
  func.func @transform_1(%arg0: i32) -> (i32, i32) {
    %c0_i32 = arith.constant 0 : i32
    %c0_i32_0 = arith.constant 0 : i32
    %c0_i32_1 = arith.constant 0 : i32
    return %c0_i32, %c0_i32_0 : i32, i32
  }
  func.func @transform_2(%arg0: i32) -> (i32, i32) {
    %c0_i32 = arith.constant 0 : i32
    %c0_i32_0 = arith.constant 0 : i32
    %c0_i32_1 = arith.constant 0 : i32
    return %c0_i32, %c0_i32_0 : i32, i32
  }
  func.func @transform_3(%arg0: i32) -> (i32, i32, i32) {
    %c0_i32 = arith.constant 0 : i32
    %c0_i32_0 = arith.constant 0 : i32
    %c0_i32_1 = arith.constant 0 : i32
    %c0_i32_2 = arith.constant 0 : i32
    return %c0_i32, %c0_i32_0, %c0_i32_1 : i32, i32, i32
  }
  func.func @transform_4(%arg0: i32) -> (i32, i32, i32) {
    %c0_i32 = arith.constant 0 : i32
    %c0_i32_0 = arith.constant 0 : i32
    %c0_i32_1 = arith.constant 0 : i32
    %c0_i32_2 = arith.constant 0 : i32
    return %c0_i32, %c0_i32_0, %c0_i32_1 : i32, i32, i32
  }
  func.func @transform_5(%arg0: i32) -> (i32, i32) {
    %c0_i32 = arith.constant 0 : i32
    %c0_i32_0 = arith.constant 0 : i32
    %c0_i32_1 = arith.constant 0 : i32
    return %c0_i32, %c0_i32_0 : i32, i32
  }
  func.func @transform_6(%arg0: i32) -> (i32, i32) {
    %c0_i32 = arith.constant 0 : i32
    %c0_i32_0 = arith.constant 0 : i32
    %c0_i32_1 = arith.constant 0 : i32
    return %c0_i32, %c0_i32_0 : i32, i32
  }
}

</mosaic_0001>

<bundles_post_ra>
// kernel: simple_mlm_forward.1
= control target key start
LH: loop header
LB: loop body
LE: loop exit
PB: predicated region body
PF: predicated region fallthrough
CT: control target
= control target key end

     0   :  { %vm53_vm0 = vcmask 261120   ;;  %s2794_s0 = inlined_call_operand.vmem [shape: f32[16,32], index: 0, kind: input, shape index: {}]   ;;  %s2795_s1 = inlined_call_operand.vmem [shape: f32[16,16], index: 1, kind: input, shape index: {}]   ;;  %s2796_s2 = inlined_call_operand.vmem [shape: f32[64,32], index: 2, kind: input, shape index: {}]   ;;  %s2797_s3 = inlined_call_operand.vmem [shape: f32[2,32,384], index: 3, kind: input, shape index: {}]   ;;  %s2798_s4 = inlined_call_operand.vmem [shape: f32[2,8,128], index: 4, kind: input, shape index: {}]   ;;  %s2799_s5 = inlined_call_operand.vmem [shape: f32[40,128], index: 5, kind: input, shape index: {}]   ;;  %s2800_s6 = inlined_call_operand.hbm [shape: f32[16,128], index: 6, kind: output, shape index: {}]  }
   0x1   :  { %v2315_v0 = vld [vmem:[%s2797_s3 + $0x48] sm:$0xff]  ;;  %v2320_v1 = vld [vmem:[%s2797_s3 + $0x30] sm:$0xff]  ;;  %v2326_v2 = vld [vmem:[%s2794_s0] sm:$0xff] }
   0x2   :  { %1966 = vmatprep.subr.mxu0 %v2315_v0  ;;  %v2332_v3 = vld [vmem:[%s2797_s3 + $0x18] sm:$0xff]  ;;  %1974 = vmatprep.mubr.msk.f32.mxu0 %vm53_vm0, %v2326_v2 }
   0x3   :  { %1967 = vmatpush3.msra.mxu0 %v2315_v0 }
   0x4   :  { %11 = vsyncpa [#allocation3], 0  ;;  %1968 = vmatprep.subr.mxu0 %v2320_v1  ;;  %v2341_v4 = vld [vmem:[%s2797_s3] sm:$0xff]  ;;  %v2348_v5 = vld [vmem:[%s2794_s0 + $0x8] sm:$0xff]  ;;  %v49_v6 = vlaneseq  ;;  %s2269_s0 = smov 96   ;;  %s2270_s13 = smov 16  }
   0x5   :  { %1969 = vmatpush3.msra.mxu0 %v2320_v1  ;;  %v2360_v9 = vld [vmem:[%s2798_s4] sm:$0xff]  ;;  %s2271_s14 = smov 32   ;;  %v2386_v16 = vld [vmem:[%s2795_s1 + $0x8] sm:$0xff]  ;;  %s2272_s17 = smov 48   ;;  %v2396_v17 = vld [vmem:[%s2796_s2 + $0x38] sm:$0xff]  ;;  %vm270_vm1 = vcmask 130048  }
   0x6   :  { %1970 = vmatprep.subr.mxu0 %v2332_v3  ;;  %v2354_v7 = vshrl.u32 %v49_v6, 7  ;;  %v2378_v15 = vld [vmem:[%s2795_s1] sm:$0xff]  ;;  %v2402_v20 = vld [vmem:[%s2796_s2 + $0x30] sm:$0xff]  ;;  %v2408_v21 = vld [vmem:[%s2796_s2 + $0x28] sm:$0xff]  ;;  %vm293_vm2 = vcmask 261248   ;;  %vm314_vm3 = vcmask 392448  }
   0x7   :  { %1971 = vmatpush3.msra.mxu0 %v2332_v3  ;;  %285 = vrot.lane.b32.xlu1 %v2378_v15, %s2270_s13  ;;  %v2417_v25 = vld [vmem:[%s2796_s2 + $0x20] sm:$0xff]  ;;  %v2425_v27 = vld [vmem:[%s2796_s2 + $0x18] sm:$0xff]  ;;  %v2433_v29 = vld [vmem:[%s2796_s2 + $0x10] sm:$0xff]  ;;  %vm335_vm4 = vcmask 523648   ;;  %vm352_vm5 = vcmask 392192   ;;  %vm355_vm6 = vcmask 523264  }
   0x8   :  { %1972 = vmatprep.subr.mxu0 %v2341_v4  ;;  %v51_v8 = vsub.s32 0, %v2354_v7  ;;  %v2441_v31 = vld [vmem:[%s2796_s2 + $0x8] sm:$0xff]  ;;  %v2449_v33 = vld [vmem:[%s2796_s2] sm:$0xff]  ;;  %s2273_s2 = smov 64   ;;  %s2274_s8 = smov [#allocation2]  }
   0x9   :  { %1973 = vmatpush3.msra.mxu0 %v2341_v4  ;;  %s1785_s9 = sshll.u32 %s2274_s8, 4  ;;  %s1786_s9 = int_to_ptr.vmem [resolvable:$true] %s1785_s9 }
   0xa   :  { %1975 = vmatmul.mubr.msk.f32.vlgmr.msra.gmra.mxu0 %vm53_vm0, %v2348_v5  ;;  %v52_v10 = vrot.slane %v2360_v9, %v51_v8  ;;  %s2247_s10 = scalar_lea.vmem %s1786_s9, 256  ;;  %p2252_p1 = scmp.lt.s32.totalorder %s1786_s9, %s1786_s9 }
   0xb   :  { %287 = vrot.lane.b32.xlu1 %v2386_v16, %s2270_s13  ;;  %p2248_p0 = scmp.ne.s32.totalorder %s1786_s9, %s2247_s10  ;;  %p2253_p2 = scmp.lt.s32.totalorder %s2247_s10, %s2247_s10 }
   0xd   :  { %p2254_p3 = por %p2253_p2, %p2252_p1 }
   0xf   :  { %308 = vrot.lane.b32.xlu1 %v2386_v16, %s2271_s14  ;;  %p2255_p4 = pnand %p2254_p3, %p2248_p0 }
  0x13   :  { %329 = vrot.lane.b32.xlu1 %v2386_v16, %s2272_s17 }
  0x79   :  { %v2459_v35 = vpop.permute.xlu1 %285 }
  0x7d   :  { %v2461_v36 = vpop.permute.xlu1 %287 }
  0x81   :  { %v2466_v40 = vpop.permute.xlu1 %308 }
  0x85   :  { %v2477_v50 = vpop.permute.xlu1 %329 }
  0xca   :  { %v1976_v11 = vpop.f32.mrf.mxu0 }
  0xcb   :  { %v2365_v12 = vadd.f32 %v1976_v11, %v52_v10 }
  0xcc   :  { %v126_v13 = vpop.f32.mrf.mxu0 }
  0xcd   :  { %v2367_v14 = vadd.f32 %v126_v13, %v52_v10  ;;  %139 = vrot.lane.b32.xlu0 %v2365_v12, %s2269_s0 }
  0xcf   :  { %1993 = vmatprep.mubr.msk.f32.mxu1 %vm53_vm0, %v2367_v14 }
  0xd1   :  { %137 = vrot.lane.b32.xlu0 %v2367_v14, %s2269_s0 }
  0xd5   :  { %306 = vrot.lane.b32.xlu0 %v2378_v15, %s2271_s14 }
  0xd9   :  { %327 = vrot.lane.b32.xlu0 %v2378_v15, %s2272_s17 }
 0x13f   :  { %v140_v18 = vpop.permute.xlu0 %139 }
 0x140   :  { %v150_v19 = vmul.f32 %v140_v18, %v2396_v17  ;;  %v148_v24 = vmul.f32 %v140_v18, %v2408_v21  ;;  %v146_v28 = vmul.f32 %v140_v18, %v2425_v27  ;;  %v144_v32 = vmul.f32 %v140_v18, %v2441_v31 }
 0x142   :  { %1977 = vmatprep.subr.msk.mxu1 %vm53_vm0, %v150_v19 }
 0x143   :  { %1978 = vmatpush3.xpose.msk.msra.mxu1 %vm53_vm0, %v150_v19  ;;  %v138_v22 = vpop.permute.xlu0 %137 }
 0x144   :  { %v149_v23 = vmul.f32 %v138_v22, %v2402_v20  ;;  %v147_v26 = vmul.f32 %v138_v22, %v2417_v25  ;;  %v145_v30 = vmul.f32 %v138_v22, %v2433_v29  ;;  %v143_v34 = vmul.f32 %v138_v22, %v2449_v33 }
 0x146   :  { %1979 = vmatprep.subr.msk.mxu1 %vm53_vm0, %v149_v23 }
 0x147   :  { %1980 = vmatpush3.xpose.msk.msra.mxu1 %vm53_vm0, %v149_v23  ;;  %v2463_v37 = vpop.permute.xlu0 %306 }
 0x148   :  { %1981 = vmatprep.subr.msk.mxu1 %vm53_vm0, %v148_v24 }
 0x14b   :  { %1982 = vmatpush3.xpose.msk.msra.mxu1 %vm53_vm0, %v148_v24  ;;  %v2473_v47 = vpop.permute.xlu0 %327 }
 0x14c   :  { %1983 = vmatprep.subr.msk.mxu1 %vm53_vm0, %v147_v26 }
 0x14f   :  { %1984 = vmatpush3.xpose.msk.msra.mxu1 %vm53_vm0, %v147_v26 }
 0x150   :  { %1985 = vmatprep.subr.msk.mxu1 %vm53_vm0, %v146_v28 }
 0x153   :  { %1986 = vmatpush3.xpose.msk.msra.mxu1 %vm53_vm0, %v146_v28 }
 0x154   :  { %1987 = vmatprep.subr.msk.mxu1 %vm53_vm0, %v145_v30 }
 0x157   :  { %1988 = vmatpush3.xpose.msk.msra.mxu1 %vm53_vm0, %v145_v30 }
 0x158   :  { %1989 = vmatprep.subr.msk.mxu1 %vm53_vm0, %v144_v32 }
 0x15b   :  { %1990 = vmatpush3.xpose.msk.msra.mxu1 %vm53_vm0, %v144_v32 }
 0x15c   :  { %1991 = vmatprep.subr.msk.mxu1 %vm53_vm0, %v143_v34 }
 0x15f   :  { %1992 = vmatpush3.xpose.msk.msra.mxu1 %vm53_vm0, %v143_v34 }
 0x162   :  { %1994 = vmatmul.mubr.msk.f32.vlgmr.msra.gmra.mxu1 %vm53_vm0, %v2365_v12 }
 0x222   :  { %v1995_v38 = vpop.f32.mrf.mxu1 }
 0x223   :  { %v269_v39 = vadd.f32 %v1995_v38, %v2386_v16  ;;  %v292_v44 = vadd.f32 %v1995_v38, %v2461_v36  ;;  %v313_v49 = vadd.f32 %v1995_v38, %v2466_v40  ;;  %v334_v54 = vadd.f32 %v1995_v38, %v2477_v50 }
 0x224   :  { %v259_v41 = vpop.f32.mrf.mxu1 }
 0x225   :  { %v274_v42 = vsel %vm270_vm1, %v269_v39, -inf  ;;  %v291_v43 = vadd.f32 %v2459_v35, %v259_v41  ;;  %v312_v46 = vadd.f32 %v2463_v37, %v259_v41  ;;  %v297_v48 = vsel %vm293_vm2, %v292_v44, -inf }
 0x226   :  { %275 = vmax.xlane.f32.xlu0 %v274_v42  ;;  %v333_v52 = vadd.f32 %v2473_v47, %v259_v41  ;;  %v318_v53 = vsel %vm314_vm3, %v313_v49, -inf  ;;  %v339_v56 = vsel %vm335_vm4, %v334_v54, -inf  ;;  %v268_v57 = vadd.f32 %v259_v41, %v2378_v15 }
 0x227   :  { %v294_v45 = vsel %vm293_vm2, %v291_v43, -inf  ;;  %v315_v51 = vsel %vm314_vm3, %v312_v46, -inf }
 0x228   :  { %295 = vmax.xlane.f32.xlu1 %v294_v45  ;;  %v336_v55 = vsel %vm335_vm4, %v333_v52, -inf  ;;  %v271_v58 = vsel %vm270_vm1, %v268_v57, -inf }
 0x22a   :  { %298 = vmax.xlane.f32.xlu0 %v297_v48 }
 0x22c   :  { %316 = vmax.xlane.f32.xlu1 %v315_v51 }
 0x22e   :  { %319 = vmax.xlane.f32.xlu0 %v318_v53 }
 0x230   :  { %337 = vmax.xlane.f32.xlu1 %v336_v55 }
 0x232   :  { %340 = vmax.xlane.f32.xlu0 %v339_v56 }
 0x236   :  { %272 = vmax.xlane.f32.xlu0 %v271_v58 }
 0x241   :  { %153 = vrot.lane.b32.xlu1 %v2365_v12, %s2273_s2 }
 0x245   :  { %530 = vrot.lane.b32.xlu1 %v2315_v0, %s2271_s14 }
 0x249   :  { %528 = vrot.lane.b32.xlu1 %v2320_v1, %s2271_s14 }
 0x24c   :  { %151 = vrot.lane.b32.xlu0 %v2367_v14, %s2273_s2 }
 0x24d   :  { %524 = vrot.lane.b32.xlu1 %v2341_v4, %s2271_s14 }
 0x250   :  { %526 = vrot.lane.b32.xlu0 %v2332_v3, %s2271_s14 }
 0x2af   :  { %v276_v59 = vpop.xlane.xlu0 %275 }
 0x2b0   :  { %v278_v63 = vsub.f32 %v269_v39, %v276_v59 }
 0x2b1   :  { %v296_v60 = vpop.xlane.xlu1 %295 }
 0x2b2   :  { %v300_v10 = vsub.f32 %v291_v43, %v296_v60  ;;  %v281_v1 = vmul.f32 1.442695, %v278_v63 }
 0x2b3   :  { %v299_v61 = vpop.xlane.xlu0 %298 }
 0x2b4   :  { %v301_v0 = vsub.f32 %v292_v44, %v299_v61  ;;  %v302_v14 = vmul.f32 1.442695, %v300_v10  ;;  %2187 = vpow2.f32 %v281_v1 }
 0x2b5   :  { %v317_v62 = vpop.xlane.xlu1 %316 }
 0x2b6   :  { %v321_v12 = vsub.f32 %v312_v46, %v317_v62  ;;  %v304_v19 = vmul.f32 1.442695, %v301_v0  ;;  %2189 = vpow2.f32 %v302_v14 }
 0x2b7   :  { %v320_v6 = vpop.xlane.xlu0 %319 }
 0x2b8   :  { %v322_v13 = vsub.f32 %v313_v49, %v320_v6  ;;  %v323_v23 = vmul.f32 1.442695, %v321_v12  ;;  %2191 = vpow2.f32 %v304_v19 }
 0x2b9   :  { %v338_v11 = vpop.xlane.xlu1 %337 }
 0x2ba   :  { %v342_v24 = vsub.f32 %v333_v52, %v338_v11  ;;  %v325_v26 = vmul.f32 1.442695, %v322_v13  ;;  %2193 = vpow2.f32 %v323_v23  ;;  %v518_v23 = vsub.s32 2, %v2354_v7 }
 0x2bb   :  { %v341_v18 = vpop.xlane.xlu0 %340 }
 0x2bc   :  { %v343_v22 = vsub.f32 %v334_v54, %v341_v18  ;;  %v344_v34 = vmul.f32 1.442695, %v342_v24  ;;  %2195 = vpow2.f32 %v325_v26  ;;  %v519_v24 = vrot.slane %v2360_v9, %v518_v23 }
 0x2bd   :  { %v154_v4 = vpop.permute.xlu1 %153 }
 0x2be   :  { %v164_v3 = vmul.f32 %v154_v4, %v2396_v17  ;;  %v346_v32 = vmul.f32 1.442695, %v343_v22  ;;  %v162_v42 = vmul.f32 %v154_v4, %v2408_v21  ;;  %v160_v44 = vmul.f32 %v154_v4, %v2425_v27 }
 0x2bf   :  { %v273_v28 = vpop.xlane.xlu0 %272  ;;  %v158_v51 = vmul.f32 %v154_v4, %v2441_v31 }
 0x2c0   :  { %v277_v30 = vsub.f32 %v268_v57, %v273_v28  ;;  %1996 = vmatprep.subr.mxu0 %v164_v3 }
 0x2c1   :  { %1997 = vmatpush3.msra.mxu0 %v164_v3  ;;  %v2188_v45 = vpop.eup %2187  ;;  %v531_v6 = vpop.permute.xlu1 %530 }
 0x2c2   :  { %v279_v38 = vmul.f32 1.442695, %v277_v30  ;;  %2034 = vmatprep.subr.mxu1 %v531_v6 }
 0x2c3   :  { %v152_v39 = vpop.permute.xlu0 %151  ;;  %v2190_v48 = vpop.eup %2189  ;;  %2035 = vmatpush3.msra.mxu1 %v531_v6 }
 0x2c4   :  { %2197 = vpow2.f32 %v279_v38  ;;  %v163_v41 = vmul.f32 %v152_v39, %v2402_v20  ;;  %v161_v43 = vmul.f32 %v152_v39, %v2417_v25  ;;  %v159_v46 = vmul.f32 %v152_v39, %v2433_v29 }
 0x2c5   :  { %2199 = vpow2.f32 %v346_v32  ;;  %v2192_v49 = vpop.eup %2191  ;;  %v157_v54 = vmul.f32 %v152_v39, %v2449_v33  ;;  %v529_v10 = vpop.permute.xlu1 %528 }
 0x2c6   :  { %2201 = vpow2.f32 %v344_v34  ;;  %1998 = vmatprep.subr.mxu0 %v163_v41  ;;  %v349_v60 = vsel %vm270_vm1, %v2188_v45, %v2192_v49  ;;  %2036 = vmatprep.subr.mxu1 %v529_v10 }
 0x2c7   :  { %1999 = vmatpush3.msra.mxu0 %v163_v41  ;;  %v2194_v52 = vpop.eup %2193  ;;  %v527_v0 = vpop.permute.xlu0 %526  ;;  %2037 = vmatpush3.msra.mxu1 %v529_v10 }
 0x2c8   :  { %2000 = vmatprep.subr.mxu0 %v162_v42  ;;  %2038 = vmatprep.subr.mxu1 %v527_v0 }
 0x2c9   :  { %2001 = vmatpush3.msra.mxu0 %v162_v42  ;;  %v2196_v53 = vpop.eup %2195  ;;  %v525_v11 = vpop.permute.xlu1 %524  ;;  %2039 = vmatpush3.msra.mxu1 %v527_v0 }
 0x2ca   :  { %2002 = vmatprep.subr.mxu0 %v161_v43  ;;  %v351_v62 = vsel %vm53_vm0, %v349_v60, %v2196_v53  ;;  %2040 = vmatprep.subr.mxu1 %v525_v11  ;;  %v40_v53 = vld [vmem:[%s2797_s3 + $0x20] sm:$0xff] }
 0x2cb   :  { %2003 = vmatpush3.msra.mxu0 %v161_v43  ;;  %2041 = vmatpush3.msra.mxu1 %v525_v11 }
 0x2cc   :  { %2004 = vmatprep.subr.mxu0 %v160_v44 }
 0x2cd   :  { %2005 = vmatpush3.msra.mxu0 %v160_v44 }
 0x2ce   :  { %2006 = vmatprep.subr.mxu0 %v159_v46 }
 0x2cf   :  { %2007 = vmatpush3.msra.mxu0 %v159_v46 }
 0x2d0   :  { %2008 = vmatprep.subr.mxu0 %v158_v51 }
 0x2d1   :  { %v2198_v55 = vpop.eup %2197  ;;  %2009 = vmatpush3.msra.mxu0 %v158_v51  ;;  %v46_v51 = vld [vmem:[%s2797_s3 + $0x50] sm:$0xff] }
 0x2d2   :  { %v2200_v56 = vpop.eup %2199  ;;  %2010 = vmatprep.subr.mxu0 %v157_v54  ;;  %v348_v57 = vsel %vm270_vm1, %v2198_v55, %v2190_v48  ;;  %v47_v55 = vld [vmem:[%s2797_s3 + $0x58] sm:$0xff] }
 0x2d3   :  { %v2202_v58 = vpop.eup %2201  ;;  %2011 = vmatpush3.msra.mxu0 %v157_v54  ;;  %v350_v59 = vsel %vm53_vm0, %v348_v57, %v2194_v52  ;;  %v354_v63 = vsel %vm352_vm5, %v351_v62, %v2200_v56  ;;  %v43_v52 = vld [vmem:[%s2797_s3 + $0x38] sm:$0xff]  ;;  %v37_v54 = vld [vmem:[%s2797_s3 + $0x8] sm:$0xff]  ;;  %v44_v56 = vld [vmem:[%s2797_s3 + $0x40] sm:$0xff]  ;;  %2056 = vmatprep.subr.mxu1 %v47_v55 }
 0x2d4   :  { %v353_v61 = vsel %vm352_vm5, %v350_v59, %v2202_v58  ;;  %2015 = vmatprep.subr.mxu0 %v2396_v17 }
 0x2d5   :  { %2012 = vmatprep.mubr.msk.f32.mxu0 %vm355_vm6, %v353_v61 }
 0x2d6   :  { %2013 = vmatmul.mubr.msk.f32.vlgmr.msra.gmra.mxu0 %vm355_vm6, %v354_v63 }
 0x2d7   :  { %2016 = vmatpush3.msra.mxu0 %v2396_v17  ;;  %2031 = vmatprep.mubr.msk.f32.mxu0 %vm355_vm6, %v353_v61 }
 0x2d8   :  { %2017 = vmatprep.subr.mxu0 %v2402_v20 }
 0x2d9   :  { %2018 = vmatpush3.msra.mxu0 %v2402_v20 }
 0x2da   :  { %2019 = vmatprep.subr.mxu0 %v2408_v21 }
 0x2db   :  { %2020 = vmatpush3.msra.mxu0 %v2408_v21 }
 0x2dc   :  { %2021 = vmatprep.subr.mxu0 %v2417_v25 }
 0x2dd   :  { %2022 = vmatpush3.msra.mxu0 %v2417_v25 }
 0x2de   :  { %2023 = vmatprep.subr.mxu0 %v2425_v27 }
 0x2df   :  { %2024 = vmatpush3.msra.mxu0 %v2425_v27 }
 0x2e0   :  { %2025 = vmatprep.subr.mxu0 %v2433_v29 }
 0x2e1   :  { %2026 = vmatpush3.msra.mxu0 %v2433_v29 }
 0x2e2   :  { %2027 = vmatprep.subr.mxu0 %v2441_v31 }
 0x2e3   :  { %2028 = vmatpush3.msra.mxu0 %v2441_v31 }
 0x2e4   :  { %2029 = vmatprep.subr.mxu0 %v2449_v33 }
 0x2e5   :  { %2030 = vmatpush3.msra.mxu0 %v2449_v33 }
 0x2e6   :  { %2032 = vmatmul.mubr.msk.f32.vlgmr.msra.gmra.mxu0 %vm355_vm6, %v354_v63  ;;  %2045 = vmatprep.subr.mxu0 %v46_v51 }
 0x2e7   :  { %2046 = vmatpush3.msra.mxu0 %v46_v51 }
 0x2e8   :  { %2047 = vmatprep.subr.mxu0 %v43_v52 }
 0x2e9   :  { %2048 = vmatpush3.msra.mxu0 %v43_v52 }
 0x2ea   :  { %2049 = vmatprep.subr.mxu0 %v40_v53 }
 0x2eb   :  { %2050 = vmatpush3.msra.mxu0 %v40_v53 }
 0x2ec   :  { %2051 = vmatprep.subr.mxu0 %v37_v54 }
 0x2ed   :  { %2052 = vmatpush3.msra.mxu0 %v37_v54 }
 0x396   :  { %v2014_v12 = vpop.f32.mrf.mxu0 }
 0x398   :  { %v428_v1 = vpop.f32.mrf.mxu0 }
 0x3a6   :  { %v2033_v13 = vpop.f32.mrf.mxu0 }
 0x3a7   :  { %2203 = vrcp.f32 %v2033_v13 }
 0x3a8   :  { %v503_v18 = vpop.f32.mrf.mxu0 }
 0x3a9   :  { %2205 = vrcp.f32 %v503_v18 }
 0x3b4   :  { %v2204_v14 = vpop.eup %2203 }
 0x3b5   :  { %v515_v4 = vmul.f32 %v2204_v14, %v2014_v12 }
 0x3b6   :  { %v2206_v19 = vpop.eup %2205 }
 0x3b7   :  { %v514_v22 = vmul.f32 %v2206_v19, %v428_v1  ;;  %v41_v19 = vld [vmem:[%s2797_s3 + $0x28] sm:$0xff] }
 0x3b9   :  { %2042 = vmatprep.mubr.msk.f32.mxu1 %vm53_vm0, %v514_v22  ;;  %v38_v22 = vld [vmem:[%s2797_s3 + $0x10] sm:$0xff] }
 0x3ba   :  { %2043 = vmatmul.mubr.msk.f32.vlgmr.msra.gmra.mxu1 %vm53_vm0, %v515_v4  ;;  %v659_v4 = vsub.s32 1, %v2354_v7 }
 0x3bb   :  { %2057 = vmatpush3.xpose.msra.mxu1 %v47_v55 }
 0x3bc   :  { %2058 = vmatprep.subr.mxu1 %v44_v56 }
 0x3bf   :  { %2059 = vmatpush3.xpose.msra.mxu1 %v44_v56 }
 0x3c0   :  { %2060 = vmatprep.subr.mxu1 %v41_v19 }
 0x3c3   :  { %2061 = vmatpush3.xpose.msra.mxu1 %v41_v19 }
 0x3c4   :  { %2062 = vmatprep.subr.mxu1 %v38_v22 }
 0x3c7   :  { %2063 = vmatpush3.xpose.msra.mxu1 %v38_v22 }
 0x47a   :  { %v2044_v3 = vpop.f32.mrf.mxu1 }
 0x47b   :  { %v614_v26 = vadd.f32 %v2044_v3, %v519_v24 }
 0x47c   :  { %v608_v28 = vpop.f32.mrf.mxu1 }
 0x47d   :  { %v609_v30 = vadd.f32 %v608_v28, %v519_v24  ;;  %v618_v32 = vadd.f32 %v614_v26, %v2348_v5 }
 0x47f   :  { %v622_v34 = vsel %vm53_vm0, %v618_v32, 0.0  ;;  %v617_v38 = vadd.f32 %v609_v30, %v2326_v2 }
 0x480   :  { %623 = vadd.xlane.f32.xlu1 %v622_v34 }
 0x481   :  { %v619_v39 = vsel %vm53_vm0, %v617_v38, 0.0 }
 0x482   :  { %620 = vadd.xlane.f32.xlu0 %v619_v39 }
 0x491   :  { %647 = vrot.lane.b32.xlu1 %v519_v24, %s2269_s0 }
 0x495   :  { %744 = vrot.lane.b32.xlu1 %v519_v24, %s2271_s14 }
 0x509   :  { %v624_v41 = vpop.xlane.xlu1 %623 }
 0x50a   :  { %v627_v42 = vmul.f32 0.03125, %v624_v41 }
 0x50b   :  { %v621_v43 = vpop.xlane.xlu0 %620 }
 0x50c   :  { %v626_v44 = vmul.f32 0.03125, %v621_v43  ;;  %v629_v45 = vsub.f32 %v618_v32, %v627_v42 }
 0x50d   :  { %v648_v6 = vpop.permute.xlu1 %647 }
 0x50e   :  { %v628_v46 = vsub.f32 %v617_v38, %v626_v44  ;;  %v631_v49 = vmul.f32 %v629_v45, %v629_v45 }
 0x510   :  { %v630_v48 = vmul.f32 %v628_v46, %v628_v46  ;;  %v635_v2 = vsel %vm53_vm0, %v631_v49, 0.0 }
 0x511   :  { %v745_v38 = vpop.permute.xlu1 %744 }
 0x512   :  { %v632_v5 = vsel %vm53_vm0, %v630_v48, 0.0 }
 0x513   :  { %633 = vadd.xlane.f32.xlu0 %v632_v5 }
 0x517   :  { %636 = vadd.xlane.f32.xlu0 %v635_v2 }
 0x52d   :  { %652 = vrot.lane.b32.xlu0 %v519_v24, %s2273_s2  ;;  %v660_v24 = vrot.slane %v2360_v9, %v659_v4 }
 0x59c   :  { %v634_v57 = vpop.xlane.xlu0 %633 }
 0x59d   :  { %v638_v58 = vmul.f32 0.03125, %v634_v57 }
 0x59f   :  { %v640_v59 = vadd.f32 1e-05, %v638_v58  ;;  %v852_v58 = vsub.s32 3, %v2354_v7 }
 0x5a0   :  { %v637_v60 = vpop.xlane.xlu0 %636 }
 0x5a1   :  { %2207 = vrsqrt.f32 %v640_v59  ;;  %v639_v61 = vmul.f32 0.03125, %v637_v60  ;;  %v2586_v59 = vld [vmem:[%s2797_s3 + $0xa8] sm:$0xff]  ;;  %v2591_v60 = vld [vmem:[%s2797_s3 + $0x90] sm:$0xff] }
 0x5a2   :  { %2067 = vmatprep.subr.mxu0 %v2586_v59 }
 0x5a3   :  { %v641_v62 = vadd.f32 1e-05, %v639_v61  ;;  %v853_v61 = vrot.slane %v2360_v9, %v852_v58 }
 0x5a4   :  { %v653_v0 = vpop.permute.xlu0 %652 }
 0x5a5   :  { %2209 = vrsqrt.f32 %v641_v62  ;;  %v2604_v62 = vld [vmem:[%s2797_s3 + $0x78] sm:$0xff] }
 0x5ae   :  { %v2208_v63 = vpop.eup %2207 }
 0x5af   :  { %v644_v10 = vmul.f32 %v2208_v63, %v628_v46  ;;  %v2611_v63 = vld [vmem:[%s2797_s3 + $0x60] sm:$0xff] }
 0x5b1   :  { %v650_v11 = vmul.f32 %v648_v6, %v644_v10 }
 0x5b2   :  { %v2210_v12 = vpop.eup %2209 }
 0x5b3   :  { %v645_v1 = vmul.f32 %v2210_v12, %v629_v45  ;;  %v655_v13 = vadd.f32 %v653_v0, %v650_v11 }
 0x5b5   :  { %v651_v18 = vmul.f32 %v648_v6, %v645_v1  ;;  %2053 = vmatprep.mubr.msk.f32.mxu0 %vm53_vm0, %v655_v13 }
 0x5b7   :  { %v656_v14 = vadd.f32 %v653_v0, %v651_v18 }
 0x5b9   :  { %2054 = vmatmul.mubr.msk.f32.vlgmr.msra.gmra.mxu0 %vm53_vm0, %v656_v14 }
 0x5ba   :  { %2068 = vmatpush3.msra.mxu0 %v2586_v59 }
 0x5bb   :  { %2069 = vmatprep.subr.mxu0 %v2591_v60 }
 0x5bc   :  { %2070 = vmatpush3.msra.mxu0 %v2591_v60 }
 0x5bd   :  { %2071 = vmatprep.subr.mxu0 %v2604_v62 }
 0x5be   :  { %2072 = vmatpush3.msra.mxu0 %v2604_v62 }
 0x5bf   :  { %2073 = vmatprep.subr.mxu0 %v2611_v63 }
 0x5c0   :  { %2074 = vmatpush3.msra.mxu0 %v2611_v63 }
 0x679   :  { %v2055_v3 = vpop.f32.mrf.mxu0 }
 0x67a   :  { %v739_v26 = vadd.f32 %v2055_v3, %v660_v24 }
 0x67b   :  { %v733_v28 = vpop.f32.mrf.mxu0 }
 0x67c   :  { %v734_v30 = vadd.f32 %v733_v28, %v660_v24  ;;  %v743_v34 = vmax.f32 %v739_v26, 0.0  ;;  %v2626_v28 = vld [vmem:[%s2798_s4 + $0x8] sm:$0xff] }
 0x67e   :  { %v742_v32 = vmax.f32 %v734_v30, 0.0  ;;  %v880_v30 = vrot.slane %v2626_v28, %v51_v8 }
 0x680   :  { %2064 = vmatprep.mubr.f32.mxu1 %v742_v32 }
 0x681   :  { %2065 = vmatmul.mubr.f32.vlgmr.msra.gmra.mxu1 %v743_v34 }
 0x741   :  { %v2066_v39 = vpop.f32.mrf.mxu1 }
 0x742   :  { %v819_v41 = vadd.f32 %v2066_v39, %v745_v38 }
 0x743   :  { %v813_v42 = vpop.f32.mrf.mxu1 }
 0x744   :  { %v814_v43 = vadd.f32 %v813_v42, %v745_v38  ;;  %v823_v44 = vadd.f32 %v819_v41, %v656_v14 }
 0x746   :  { %v827_v45 = vsel %vm53_vm0, %v823_v44, 0.0  ;;  %v822_v46 = vadd.f32 %v814_v43, %v655_v13 }
 0x747   :  { %828 = vadd.xlane.f32.xlu0 %v827_v45 }
 0x748   :  { %v824_v48 = vsel %vm53_vm0, %v822_v46, 0.0 }
 0x749   :  { %825 = vadd.xlane.f32.xlu1 %v824_v48 }
 0x7d0   :  { %v829_v5 = vpop.xlane.xlu0 %828 }
 0x7d1   :  { %v831_v49 = vmul.f32 0.03125, %v829_v5 }
 0x7d2   :  { %v826_v2 = vpop.xlane.xlu1 %825 }
 0x7d3   :  { %v833_v51 = vsub.f32 %v823_v44, %v831_v49  ;;  %v830_v52 = vmul.f32 0.03125, %v826_v2 }
 0x7d5   :  { %v832_v53 = vsub.f32 %v822_v46, %v830_v52  ;;  %v835_v54 = vmul.f32 %v833_v51, %v833_v51 }
 0x7d7   :  { %v839_v55 = vsel %vm53_vm0, %v835_v54, 0.0  ;;  %v834_v56 = vmul.f32 %v832_v53, %v832_v53 }
 0x7d8   :  { %840 = vadd.xlane.f32.xlu1 %v839_v55 }
 0x7d9   :  { %v836_v57 = vsel %vm53_vm0, %v834_v56, 0.0 }
 0x7da   :  { %837 = vadd.xlane.f32.xlu0 %v836_v57 }
 0x7f0   :  { %857 = vrot.lane.b32.xlu0 %v853_v61, %s2269_s0 }
 0x861   :  { %v841_v9 = vpop.xlane.xlu1 %840 }
 0x862   :  { %v843_v6 = vmul.f32 0.03125, %v841_v9 }
 0x863   :  { %v838_v10 = vpop.xlane.xlu0 %837 }
 0x864   :  { %v845_v0 = vadd.f32 1e-05, %v843_v6  ;;  %v842_v11 = vmul.f32 0.03125, %v838_v10 }
 0x866   :  { %2211 = vrsqrt.f32 %v845_v0  ;;  %v844_v12 = vadd.f32 1e-05, %v842_v11 }
 0x867   :  { %v858_v24 = vpop.permute.xlu0 %857 }
 0x868   :  { %2213 = vrsqrt.f32 %v844_v12 }
 0x873   :  { %v2212_v1 = vpop.eup %2211 }
 0x874   :  { %v849_v13 = vmul.f32 %v2212_v1, %v833_v51 }
 0x875   :  { %v2214_v18 = vpop.eup %2213 }
 0x876   :  { %v848_v14 = vmul.f32 %v2214_v18, %v832_v53  ;;  %v855_v19 = vmul.f32 %v853_v61, %v849_v13 }
 0x878   :  { %v854_v22 = vmul.f32 %v853_v61, %v848_v14  ;;  %v2617_v26 = vadd.f32 %v858_v24, %v855_v19 }
 0x87a   :  { %v2615_v3 = vadd.f32 %v858_v24, %v854_v22 }
 0x87c   :  { %2075 = vmatprep.mubr.msk.f32.mxu0 %vm53_vm0, %v2615_v3 }
 0x87d   :  { %2076 = vmatmul.mubr.msk.f32.vlgmr.msra.gmra.mxu0 %vm53_vm0, %v2617_v26 }
 0x93d   :  { %v2077_v32 = vpop.f32.mrf.mxu0 }
 0x93e   :  { %v959_v34 = vadd.f32 %v2077_v32, %v880_v30 }
 0x93f   :  { %v953_v38 = vpop.f32.mrf.mxu0 }
 0x940   :  { %v954_v39 = vadd.f32 %v953_v38, %v880_v30  ;;  %966 = vrot.lane.b32.xlu1 %v959_v34, %s2269_s0 }
 0x942   :  { %2094 = vmatprep.mubr.msk.f32.mxu0 %vm53_vm0, %v954_v39 }
 0x944   :  { %964 = vrot.lane.b32.xlu1 %v954_v39, %s2269_s0 }
 0x9b2   :  { %v967_v41 = vpop.permute.xlu1 %966 }
 0x9b3   :  { %v977_v42 = vmul.f32 %v967_v41, %v2396_v17  ;;  %v975_v44 = vmul.f32 %v967_v41, %v2408_v21  ;;  %v973_v46 = vmul.f32 %v967_v41, %v2425_v27  ;;  %v971_v5 = vmul.f32 %v967_v41, %v2441_v31 }
 0x9b5   :  { %2078 = vmatprep.subr.msk.mxu0 %vm53_vm0, %v977_v42 }
 0x9b6   :  { %2079 = vmatpush3.xpose.msk.msra.mxu0 %vm53_vm0, %v977_v42  ;;  %v965_v43 = vpop.permute.xlu1 %964 }
 0x9b7   :  { %v976_v8 = vmul.f32 %v965_v43, %v2402_v20  ;;  %v974_v45 = vmul.f32 %v965_v43, %v2417_v25  ;;  %v972_v48 = vmul.f32 %v965_v43, %v2433_v29  ;;  %v970_v49 = vmul.f32 %v965_v43, %v2449_v33 }
 0x9b9   :  { %2080 = vmatprep.subr.msk.mxu0 %vm53_vm0, %v976_v8 }
 0x9ba   :  { %2081 = vmatpush3.xpose.msk.msra.mxu0 %vm53_vm0, %v976_v8 }
 0x9bb   :  { %2082 = vmatprep.subr.msk.mxu0 %vm53_vm0, %v975_v44 }
 0x9be   :  { %2083 = vmatpush3.xpose.msk.msra.mxu0 %vm53_vm0, %v975_v44 }
 0x9bf   :  { %2084 = vmatprep.subr.msk.mxu0 %vm53_vm0, %v974_v45 }
 0x9c2   :  { %2085 = vmatpush3.xpose.msk.msra.mxu0 %vm53_vm0, %v974_v45 }
 0x9c3   :  { %2086 = vmatprep.subr.msk.mxu0 %vm53_vm0, %v973_v46 }
 0x9c6   :  { %2087 = vmatpush3.xpose.msk.msra.mxu0 %vm53_vm0, %v973_v46 }
 0x9c7   :  { %2088 = vmatprep.subr.msk.mxu0 %vm53_vm0, %v972_v48 }
 0x9ca   :  { %2089 = vmatpush3.xpose.msk.msra.mxu0 %vm53_vm0, %v972_v48 }
 0x9cb   :  { %2090 = vmatprep.subr.msk.mxu0 %vm53_vm0, %v971_v5 }
 0x9ce   :  { %2091 = vmatpush3.xpose.msk.msra.mxu0 %vm53_vm0, %v971_v5 }
 0x9cf   :  { %2092 = vmatprep.subr.msk.mxu0 %vm53_vm0, %v970_v49 }
 0x9d2   :  { %2093 = vmatpush3.xpose.msk.msra.mxu0 %vm53_vm0, %v970_v49 }
 0x9d5   :  { %2095 = vmatmul.mubr.msk.f32.vlgmr.msra.gmra.mxu0 %vm53_vm0, %v959_v34 }
 0xa95   :  { %v2096_v2 = vpop.f32.mrf.mxu0 }
 0xa96   :  { %v1096_v51 = vadd.f32 %v2096_v2, %v2386_v16  ;;  %v1110_v55 = vadd.f32 %v2096_v2, %v2461_v36  ;;  %v1124_v9 = vadd.f32 %v2096_v2, %v2466_v40  ;;  %v1138_v36 = vadd.f32 %v2096_v2, %v2477_v50 }
 0xa97   :  { %v1086_v52 = vpop.f32.mrf.mxu0 }
 0xa98   :  { %v1100_v53 = vsel %vm270_vm1, %v1096_v51, -inf  ;;  %v1109_v54 = vadd.f32 %v1086_v52, %v2459_v35  ;;  %v1123_v57 = vadd.f32 %v1086_v52, %v2463_v37  ;;  %v1114_v61 = vsel %vm293_vm2, %v1110_v55, -inf }
 0xa99   :  { %1101 = vmax.xlane.f32.xlu0 %v1100_v53  ;;  %v1137_v6 = vadd.f32 %v1086_v52, %v2473_v47  ;;  %v1128_v35 = vsel %vm314_vm3, %v1124_v9, -inf  ;;  %v1142_v37 = vsel %vm335_vm4, %v1138_v36, -inf  ;;  %v1095_v0 = vadd.f32 %v1086_v52, %v2378_v15 }
 0xa9a   :  { %v1111_v56 = vsel %vm293_vm2, %v1109_v54, -inf  ;;  %v1125_v16 = vsel %vm314_vm3, %v1123_v57, -inf }
 0xa9b   :  { %1112 = vmax.xlane.f32.xlu1 %v1111_v56  ;;  %v1139_v10 = vsel %vm335_vm4, %v1137_v6, -inf  ;;  %v1097_v40 = vsel %vm270_vm1, %v1095_v0, -inf }
 0xa9d   :  { %1115 = vmax.xlane.f32.xlu0 %v1114_v61 }
 0xa9f   :  { %1126 = vmax.xlane.f32.xlu1 %v1125_v16 }
 0xaa1   :  { %1129 = vmax.xlane.f32.xlu0 %v1128_v35 }
 0xaa3   :  { %1140 = vmax.xlane.f32.xlu1 %v1139_v10 }
 0xaa5   :  { %1143 = vmax.xlane.f32.xlu0 %v1142_v37 }
 0xaa9   :  { %1098 = vmax.xlane.f32.xlu0 %v1097_v40 }
 0xab4   :  { %980 = vrot.lane.b32.xlu1 %v959_v34, %s2273_s2 }
 0xab8   :  { %1331 = vrot.lane.b32.xlu1 %v2586_v59, %s2271_s14 }
 0xabc   :  { %1329 = vrot.lane.b32.xlu1 %v2591_v60, %s2271_s14 }
 0xabf   :  { %978 = vrot.lane.b32.xlu0 %v954_v39, %s2273_s2 }
 0xac0   :  { %1325 = vrot.lane.b32.xlu1 %v2611_v63, %s2271_s14 }
 0xac3   :  { %1327 = vrot.lane.b32.xlu0 %v2604_v62, %s2271_s14 }
 0xb22   :  { %v1102_v15 = vpop.xlane.xlu0 %1101 }
 0xb23   :  { %v1104_v12 = vsub.f32 %v1096_v51, %v1102_v15 }
 0xb24   :  { %v1113_v47 = vpop.xlane.xlu1 %1112 }
 0xb25   :  { %v1117_v13 = vsub.f32 %v1109_v54, %v1113_v47  ;;  %v1107_v19 = vmul.f32 1.442695, %v1104_v12 }
 0xb26   :  { %v1116_v50 = vpop.xlane.xlu0 %1115 }
 0xb27   :  { %v1118_v18 = vsub.f32 %v1110_v55, %v1116_v50  ;;  %v1119_v24 = vmul.f32 1.442695, %v1117_v13  ;;  %2215 = vpow2.f32 %v1107_v19 }
 0xb28   :  { %v1127_v11 = vpop.xlane.xlu1 %1126 }
 0xb29   :  { %v1131_v14 = vsub.f32 %v1123_v57, %v1127_v11  ;;  %v1121_v30 = vmul.f32 1.442695, %v1118_v18  ;;  %2217 = vpow2.f32 %v1119_v24  ;;  %v1320_v11 = vrot.slane %v2626_v28, %v518_v23 }
 0xb2a   :  { %v1130_v1 = vpop.xlane.xlu0 %1129 }
 0xb2b   :  { %v1132_v60 = vsub.f32 %v1124_v9, %v1130_v1  ;;  %v1133_v34 = vmul.f32 1.442695, %v1131_v14  ;;  %2219 = vpow2.f32 %v1121_v30 }
 0xb2c   :  { %v1141_v59 = vpop.xlane.xlu1 %1140 }
 0xb2d   :  { %v1145_v38 = vsub.f32 %v1137_v6, %v1141_v59  ;;  %v1135_v39 = vmul.f32 1.442695, %v1132_v60  ;;  %2221 = vpow2.f32 %v1133_v34 }
 0xb2e   :  { %v1144_v22 = vpop.xlane.xlu0 %1143 }
 0xb2f   :  { %v1146_v32 = vsub.f32 %v1138_v36, %v1144_v22  ;;  %v1147_v8 = vmul.f32 1.442695, %v1145_v38  ;;  %2223 = vpow2.f32 %v1135_v39  ;;  %v1823_v39 = vld [vmem:[%s2797_s3 + $0x98] sm:$0xff] }
 0xb30   :  { %v981_v63 = vpop.permute.xlu1 %980 }
 0xb31   :  { %v991_v62 = vmul.f32 %v981_v63, %v2396_v17  ;;  %v1149_v43 = vmul.f32 1.442695, %v1146_v32  ;;  %v989_v48 = vmul.f32 %v981_v63, %v2408_v21  ;;  %v987_v49 = vmul.f32 %v981_v63, %v2425_v27 }
 0xb32   :  { %v1099_v41 = vpop.xlane.xlu0 %1098  ;;  %v985_v54 = vmul.f32 %v981_v63, %v2441_v31 }
 0xb33   :  { %v1103_v42 = vsub.f32 %v1095_v0, %v1099_v41  ;;  %2097 = vmatprep.subr.mxu1 %v991_v62  ;;  %v1820_v41 = vld [vmem:[%s2797_s3 + $0x80] sm:$0xff] }
 0xb34   :  { %2098 = vmatpush3.msra.mxu1 %v991_v62  ;;  %v2216_v2 = vpop.eup %2215  ;;  %v1826_v62 = vld [vmem:[%s2797_s3 + $0xb0] sm:$0xff] }
 0xb35   :  { %v1105_v44 = vmul.f32 1.442695, %v1103_v42  ;;  %v1817_v42 = vld [vmem:[%s2797_s3 + $0x68] sm:$0xff] }
 0xb36   :  { %v979_v45 = vpop.permute.xlu0 %978  ;;  %v2218_v52 = vpop.eup %2217 }
 0xb37   :  { %2225 = vpow2.f32 %v1105_v44  ;;  %v990_v46 = vmul.f32 %v979_v45, %v2402_v20  ;;  %v988_v5 = vmul.f32 %v979_v45, %v2417_v25  ;;  %v986_v51 = vmul.f32 %v979_v45, %v2433_v29 }
 0xb38   :  { %2227 = vpow2.f32 %v1149_v43  ;;  %v2220_v53 = vpop.eup %2219  ;;  %v984_v57 = vmul.f32 %v979_v45, %v2449_v33  ;;  %v1827_v43 = vld [vmem:[%s2797_s3 + $0xb8] sm:$0xff] }
 0xb39   :  { %2229 = vpow2.f32 %v1147_v8  ;;  %2099 = vmatprep.subr.mxu1 %v990_v46  ;;  %v1152_v36 = vsel %vm270_vm1, %v2216_v2, %v2220_v53  ;;  %v1824_v8 = vld [vmem:[%s2797_s3 + $0xa0] sm:$0xff] }
 0xb3a   :  { %2100 = vmatpush3.msra.mxu1 %v990_v46  ;;  %v2222_v55 = vpop.eup %2221 }
 0xb3b   :  { %2101 = vmatprep.subr.mxu1 %v989_v48 }
 0xb3c   :  { %2102 = vmatpush3.msra.mxu1 %v989_v48  ;;  %v2224_v56 = vpop.eup %2223 }
 0xb3d   :  { %2103 = vmatprep.subr.mxu1 %v988_v5  ;;  %v1154_v37 = vsel %vm53_vm0, %v1152_v36, %v2224_v56 }
 0xb3e   :  { %2104 = vmatpush3.msra.mxu1 %v988_v5 }
 0xb3f   :  { %2105 = vmatprep.subr.mxu1 %v987_v49 }
 0xb40   :  { %2106 = vmatpush3.msra.mxu1 %v987_v49 }
 0xb41   :  { %2107 = vmatprep.subr.mxu1 %v986_v51 }
 0xb42   :  { %2108 = vmatpush3.msra.mxu1 %v986_v51 }
 0xb43   :  { %2109 = vmatprep.subr.mxu1 %v985_v54 }
 0xb44   :  { %v2226_v61 = vpop.eup %2225  ;;  %2110 = vmatpush3.msra.mxu1 %v985_v54 }
 0xb45   :  { %v2228_v9 = vpop.eup %2227  ;;  %2111 = vmatprep.subr.mxu1 %v984_v57  ;;  %v1151_v16 = vsel %vm270_vm1, %v2226_v61, %v2218_v52 }
 0xb46   :  { %v2230_v6 = vpop.eup %2229  ;;  %2112 = vmatpush3.msra.mxu1 %v984_v57  ;;  %v1153_v35 = vsel %vm53_vm0, %v1151_v16, %v2222_v55  ;;  %v1156_v0 = vsel %vm352_vm5, %v1154_v37, %v2228_v9  ;;  %v1821_v16 = vld [vmem:[%s2797_s3 + $0x88] sm:$0xff] }
 0xb47   :  { %v1155_v10 = vsel %vm352_vm5, %v1153_v35, %v2230_v6  ;;  %2116 = vmatprep.subr.mxu1 %v2396_v17  ;;  %v1818_v6 = vld [vmem:[%s2797_s3 + $0x70] sm:$0xff]  ;;  %v1460_v35 = vrot.slane %v2626_v28, %v659_v4 }
 0xb48   :  { %2113 = vmatprep.mubr.msk.f32.mxu1 %vm355_vm6, %v1155_v10 }
 0xb49   :  { %2114 = vmatmul.mubr.msk.f32.vlgmr.msra.gmra.mxu1 %vm355_vm6, %v1156_v0 }
 0xb4a   :  { %2117 = vmatpush3.msra.mxu1 %v2396_v17  ;;  %2132 = vmatprep.mubr.msk.f32.mxu1 %vm355_vm6, %v1155_v10  ;;  %v1332_v17 = vpop.permute.xlu1 %1331 }
 0xb4b   :  { %2118 = vmatprep.subr.mxu1 %v2402_v20  ;;  %2135 = vmatprep.subr.mxu0 %v1332_v17 }
 0xb4c   :  { %2119 = vmatpush3.msra.mxu1 %v2402_v20  ;;  %2136 = vmatpush3.msra.mxu0 %v1332_v17 }
 0xb4d   :  { %2120 = vmatprep.subr.mxu1 %v2408_v21 }
 0xb4e   :  { %2121 = vmatpush3.msra.mxu1 %v2408_v21  ;;  %v1330_v20 = vpop.permute.xlu1 %1329  ;;  %v1328_v21 = vpop.permute.xlu0 %1327 }
 0xb4f   :  { %2122 = vmatprep.subr.mxu1 %v2417_v25  ;;  %2137 = vmatprep.subr.mxu0 %v1330_v20 }
 0xb50   :  { %2123 = vmatpush3.msra.mxu1 %v2417_v25  ;;  %2138 = vmatpush3.msra.mxu0 %v1330_v20 }
 0xb51   :  { %2124 = vmatprep.subr.mxu1 %v2425_v27  ;;  %2139 = vmatprep.subr.mxu0 %v1328_v21 }
 0xb52   :  { %2125 = vmatpush3.msra.mxu1 %v2425_v27  ;;  %v1326_v25 = vpop.permute.xlu1 %1325  ;;  %2140 = vmatpush3.msra.mxu0 %v1328_v21 }
 0xb53   :  { %2126 = vmatprep.subr.mxu1 %v2433_v29  ;;  %2141 = vmatprep.subr.mxu0 %v1326_v25 }
 0xb54   :  { %2127 = vmatpush3.msra.mxu1 %v2433_v29  ;;  %2142 = vmatpush3.msra.mxu0 %v1326_v25 }
 0xb55   :  { %2128 = vmatprep.subr.mxu1 %v2441_v31  ;;  %2157 = vmatprep.subr.mxu0 %v1827_v43 }
 0xb56   :  { %2129 = vmatpush3.msra.mxu1 %v2441_v31 }
 0xb57   :  { %2130 = vmatprep.subr.mxu1 %v2449_v33 }
 0xb58   :  { %2131 = vmatpush3.msra.mxu1 %v2449_v33 }
 0xb59   :  { %2133 = vmatmul.mubr.msk.f32.vlgmr.msra.gmra.mxu1 %vm355_vm6, %v1156_v0  ;;  %2146 = vmatprep.subr.mxu1 %v1826_v62 }
 0xb5a   :  { %2147 = vmatpush3.msra.mxu1 %v1826_v62 }
 0xb5b   :  { %2148 = vmatprep.subr.mxu1 %v1823_v39 }
 0xb5c   :  { %2149 = vmatpush3.msra.mxu1 %v1823_v39 }
 0xb5d   :  { %2150 = vmatprep.subr.mxu1 %v1820_v41 }
 0xb5e   :  { %2151 = vmatpush3.msra.mxu1 %v1820_v41 }
 0xb5f   :  { %2152 = vmatprep.subr.mxu1 %v1817_v42 }
 0xb60   :  { %2153 = vmatpush3.msra.mxu1 %v1817_v42 }
 0xc09   :  { %v2115_v27 = vpop.f32.mrf.mxu1 }
 0xc0b   :  { %v1229_v29 = vpop.f32.mrf.mxu1 }
 0xc19   :  { %v2134_v31 = vpop.f32.mrf.mxu1 }
 0xc1a   :  { %2231 = vrcp.f32 %v2134_v31 }
 0xc1b   :  { %v1304_v40 = vpop.f32.mrf.mxu1 }
 0xc1c   :  { %2233 = vrcp.f32 %v1304_v40 }
 0xc27   :  { %v2232_v33 = vpop.eup %2231 }
 0xc28   :  { %v1316_v50 = vmul.f32 %v2232_v33, %v2115_v27 }
 0xc29   :  { %v2234_v15 = vpop.eup %2233 }
 0xc2a   :  { %v1315_v47 = vmul.f32 %v2234_v15, %v1229_v29 }
 0xc2c   :  { %2143 = vmatprep.mubr.msk.f32.mxu0 %vm53_vm0, %v1315_v47 }
 0xc2d   :  { %2144 = vmatmul.mubr.msk.f32.vlgmr.msra.gmra.mxu0 %vm53_vm0, %v1316_v50 }
 0xc2e   :  { %2158 = vmatpush3.xpose.msra.mxu0 %v1827_v43 }
 0xc2f   :  { %2159 = vmatprep.subr.mxu0 %v1824_v8 }
 0xc32   :  { %2160 = vmatpush3.xpose.msra.mxu0 %v1824_v8 }
 0xc33   :  { %2161 = vmatprep.subr.mxu0 %v1821_v16 }
 0xc36   :  { %2162 = vmatpush3.xpose.msra.mxu0 %v1821_v16 }
 0xc37   :  { %2163 = vmatprep.subr.mxu0 %v1818_v6 }
 0xc3a   :  { %2164 = vmatpush3.xpose.msra.mxu0 %v1818_v6 }
 0xced   :  { %v2145_v12 = vpop.f32.mrf.mxu0 }
 0xcee   :  { %v1415_v1 = vadd.f32 %v2145_v12, %v1320_v11 }
 0xcef   :  { %v1409_v13 = vpop.f32.mrf.mxu0 }
 0xcf0   :  { %v1410_v18 = vadd.f32 %v1409_v13, %v1320_v11  ;;  %v1419_v59 = vadd.f32 %v1415_v1, %v2617_v26 }
 0xcf2   :  { %v1423_v14 = vsel %vm53_vm0, %v1419_v59, 0.0  ;;  %v1418_v19 = vadd.f32 %v1410_v18, %v2615_v3 }
 0xcf3   :  { %1424 = vadd.xlane.f32.xlu1 %v1423_v14 }
 0xcf4   :  { %v1420_v60 = vsel %vm53_vm0, %v1418_v19, 0.0 }
 0xcf5   :  { %1421 = vadd.xlane.f32.xlu0 %v1420_v60  ;;  %v1653_v60 = vrot.slane %v2626_v28, %v852_v58 }
 0xd04   :  { %1447 = vrot.lane.b32.xlu1 %v1320_v11, %s2269_s0 }
 0xd08   :  { %1544 = vrot.lane.b32.xlu1 %v1320_v11, %s2271_s14 }
 0xd7c   :  { %v1425_v22 = vpop.xlane.xlu1 %1424 }
 0xd7d   :  { %v1427_v23 = vmul.f32 0.03125, %v1425_v22 }
 0xd7e   :  { %v1422_v24 = vpop.xlane.xlu0 %1421 }
 0xd7f   :  { %v1426_v30 = vmul.f32 0.03125, %v1422_v24  ;;  %v1429_v32 = vsub.f32 %v1419_v59, %v1427_v23 }
 0xd80   :  { %v1448_v51 = vpop.permute.xlu1 %1447 }
 0xd81   :  { %v1428_v63 = vsub.f32 %v1418_v19, %v1426_v30  ;;  %v1431_v38 = vmul.f32 %v1429_v32, %v1429_v32 }
 0xd83   :  { %v1430_v34 = vmul.f32 %v1428_v63, %v1428_v63  ;;  %v1435_v3 = vsel %vm53_vm0, %v1431_v38, 0.0 }
 0xd84   :  { %v1545_v21 = vpop.permute.xlu1 %1544 }
 0xd85   :  { %v1432_v26 = vsel %vm53_vm0, %v1430_v34, 0.0 }
 0xd86   :  { %1433 = vadd.xlane.f32.xlu0 %v1432_v26 }
 0xd8a   :  { %1436 = vadd.xlane.f32.xlu0 %v1435_v3 }
 0xda0   :  { %1452 = vrot.lane.b32.xlu0 %v1320_v11, %s2273_s2 }
 0xe0f   :  { %v1434_v44 = vpop.xlane.xlu0 %1433 }
 0xe10   :  { %v1438_v45 = vmul.f32 0.03125, %v1434_v44 }
 0xe12   :  { %v1440_v46 = vadd.f32 1e-05, %v1438_v45 }
 0xe13   :  { %v1437_v48 = vpop.xlane.xlu0 %1436 }
 0xe14   :  { %2235 = vrsqrt.f32 %v1440_v46  ;;  %v1439_v5 = vmul.f32 0.03125, %v1437_v48 }
 0xe16   :  { %v1441_v49 = vadd.f32 1e-05, %v1439_v5 }
 0xe17   :  { %v1453_v53 = vpop.permute.xlu0 %1452 }
 0xe18   :  { %2237 = vrsqrt.f32 %v1441_v49 }
 0xe21   :  { %v2236_v2 = vpop.eup %2235 }
 0xe22   :  { %v1444_v52 = vmul.f32 %v2236_v2, %v1428_v63 }
 0xe24   :  { %v1450_v54 = vmul.f32 %v1448_v51, %v1444_v52  ;;  %v1691_v52 = vld [vmem:[%s2799_s5 + $0x18] sm:$0xff] }
 0xe25   :  { %v2238_v55 = vpop.eup %2237  ;;  %2168 = vmatprep.subr.mxu1 %v1691_v52 }
 0xe26   :  { %v1445_v56 = vmul.f32 %v2238_v55, %v1429_v32  ;;  %v1455_v57 = vadd.f32 %v1453_v53, %v1450_v54  ;;  %v1689_v54 = vld [vmem:[%s2799_s5 + $0x8] sm:$0xff]  ;;  %v1688_v55 = vld [vmem:[%s2799_s5] sm:$0xff] }
 0xe28   :  { %v1451_v61 = vmul.f32 %v1448_v51, %v1445_v56  ;;  %2154 = vmatprep.mubr.msk.f32.mxu1 %vm53_vm0, %v1455_v57 }
 0xe2a   :  { %v1456_v9 = vadd.f32 %v1453_v53, %v1451_v61  ;;  %v1690_v53 = vld [vmem:[%s2799_s5 + $0x10] sm:$0xff] }
 0xe2c   :  { %2155 = vmatmul.mubr.msk.f32.vlgmr.msra.gmra.mxu1 %vm53_vm0, %v1456_v9 }
 0xe2d   :  { %2169 = vmatpush3.msra.mxu1 %v1691_v52 }
 0xe2e   :  { %2170 = vmatprep.subr.mxu1 %v1690_v53 }
 0xe2f   :  { %2171 = vmatpush3.msra.mxu1 %v1690_v53 }
 0xe30   :  { %2172 = vmatprep.subr.mxu1 %v1689_v54 }
 0xe31   :  { %2173 = vmatpush3.msra.mxu1 %v1689_v54 }
 0xe32   :  { %2174 = vmatprep.subr.mxu1 %v1688_v55 }
 0xe33   :  { %2175 = vmatpush3.msra.mxu1 %v1688_v55 }
 0xeec   :  { %v2156_v36 = vpop.f32.mrf.mxu1 }
 0xeed   :  { %v1539_v10 = vadd.f32 %v2156_v36, %v1460_v35 }
 0xeee   :  { %v1533_v37 = vpop.f32.mrf.mxu1 }
 0xeef   :  { %v1534_v0 = vadd.f32 %v1533_v37, %v1460_v35  ;;  %v1543_v20 = vmax.f32 %v1539_v10, 0.0 }
 0xef1   :  { %v1542_v17 = vmax.f32 %v1534_v0, 0.0  ;;  %v1849_v0 = vld [vmem:[%s2799_s5 + $0x20] ss:$0 sm:$0xff] }
 0xef3   :  { %2165 = vmatprep.mubr.f32.mxu0 %v1542_v17 }
 0xef4   :  { %2166 = vmatmul.mubr.f32.vlgmr.msra.gmra.mxu0 %v1543_v20 }
 0xfb4   :  { %v2167_v25 = vpop.f32.mrf.mxu0 }
 0xfb5   :  { %v1619_v27 = vadd.f32 %v2167_v25, %v1545_v21 }
 0xfb6   :  { %v1613_v29 = vpop.f32.mrf.mxu0 }
 0xfb7   :  { %v1614_v31 = vadd.f32 %v1613_v29, %v1545_v21  ;;  %v1623_v40 = vadd.f32 %v1619_v27, %v1456_v9 }
 0xfb9   :  { %v1627_v33 = vsel %vm53_vm0, %v1623_v40, 0.0  ;;  %v1622_v15 = vadd.f32 %v1614_v31, %v1455_v57 }
 0xfba   :  { %1628 = vadd.xlane.f32.xlu0 %v1627_v33 }
 0xfbb   :  { %v1624_v4 = vsel %vm53_vm0, %v1622_v15, 0.0 }
 0xfbc   :  { %1625 = vadd.xlane.f32.xlu1 %v1624_v4 }
0x1043   :  { %v1629_v47 = vpop.xlane.xlu0 %1628 }
0x1044   :  { %v1631_v50 = vmul.f32 0.03125, %v1629_v47 }
0x1045   :  { %v1626_v11 = vpop.xlane.xlu1 %1625 }
0x1046   :  { %v1633_v12 = vsub.f32 %v1623_v40, %v1631_v50  ;;  %v1630_v1 = vmul.f32 0.03125, %v1626_v11 }
0x1048   :  { %v1632_v13 = vsub.f32 %v1622_v15, %v1630_v1  ;;  %v1635_v18 = vmul.f32 %v1633_v12, %v1633_v12 }
0x104a   :  { %v1639_v59 = vsel %vm53_vm0, %v1635_v18, 0.0  ;;  %v1634_v14 = vmul.f32 %v1632_v13, %v1632_v13 }
0x104b   :  { %1640 = vadd.xlane.f32.xlu1 %v1639_v59 }
0x104c   :  { %v1636_v19 = vsel %vm53_vm0, %v1634_v14, 0.0 }
0x104d   :  { %1637 = vadd.xlane.f32.xlu0 %v1636_v19 }
0x1063   :  { %1657 = vrot.lane.b32.xlu0 %v1653_v60, %s2269_s0 }
0x10d4   :  { %v1641_v22 = vpop.xlane.xlu1 %1640 }
0x10d5   :  { %v1643_v23 = vmul.f32 0.03125, %v1641_v22 }
0x10d6   :  { %v1638_v24 = vpop.xlane.xlu0 %1637 }
0x10d7   :  { %v1645_v30 = vadd.f32 1e-05, %v1643_v23  ;;  %v1642_v32 = vmul.f32 0.03125, %v1638_v24 }
0x10d9   :  { %2239 = vrsqrt.f32 %v1645_v30  ;;  %v1644_v63 = vadd.f32 1e-05, %v1642_v32 }
0x10da   :  { %v1658_v41 = vpop.permute.xlu0 %1657 }
0x10db   :  { %2241 = vrsqrt.f32 %v1644_v63 }
0x10e6   :  { %v2240_v34 = vpop.eup %2239 }
0x10e7   :  { %v1649_v26 = vmul.f32 %v2240_v34, %v1633_v12 }
0x10e8   :  { %v2242_v38 = vpop.eup %2241 }
0x10e9   :  { %v1648_v3 = vmul.f32 %v2242_v38, %v1632_v13  ;;  %v1655_v39 = vmul.f32 %v1653_v60, %v1649_v26 }
0x10eb   :  { %v1654_v62 = vmul.f32 %v1653_v60, %v1648_v3  ;;  %v1661_v42 = vadd.f32 %v1658_v41, %v1655_v39 }
0x10ed   :  { %v1660_v7 = vadd.f32 %v1658_v41, %v1654_v62  ;;  %v1665_v28 = vsel %vm53_vm0, %v1661_v42, 0.0 }
0x10ef   :  { %v1662_v58 = vsel %vm53_vm0, %v1660_v7, 0.0 }
0x10f0   :  { %1663 = vadd.xlane.f32.xlu1 %v1662_v58 }
0x10f4   :  { %1666 = vadd.xlane.f32.xlu1 %v1665_v28 }
0x1179   :  { %v1664_v43 = vpop.xlane.xlu1 %1663 }
0x117a   :  { %v1668_v8 = vmul.f32 0.03125, %v1664_v43 }
0x117c   :  { %v1670_v44 = vsub.f32 %v1660_v7, %v1668_v8 }
0x117d   :  { %v1667_v45 = vpop.xlane.xlu1 %1666 }
0x117e   :  { %v1669_v46 = vmul.f32 0.03125, %v1667_v45  ;;  %v1672_v48 = vmul.f32 %v1670_v44, %v1670_v44 }
0x1180   :  { %v1671_v5 = vsub.f32 %v1661_v42, %v1669_v46  ;;  %v1674_v49 = vsel %vm53_vm0, %v1672_v48, 0.0 }
0x1181   :  { %1675 = vadd.xlane.f32.xlu1 %v1674_v49 }
0x1182   :  { %v1673_v2 = vmul.f32 %v1671_v5, %v1671_v5 }
0x1184   :  { %v1677_v51 = vsel %vm53_vm0, %v1673_v2, 0.0 }
0x1185   :  { %1678 = vadd.xlane.f32.xlu1 %v1677_v51 }
0x120a   :  { %v1676_v56 = vpop.xlane.xlu1 %1675 }
0x120b   :  { %v1680_v57 = vmul.f32 0.03125, %v1676_v56 }
0x120d   :  { %v1682_v61 = vadd.f32 1e-05, %v1680_v57 }
0x120e   :  { %v1679_v9 = vpop.xlane.xlu1 %1678 }
0x120f   :  { %2243 = vrsqrt.f32 %v1682_v61  ;;  %v1681_v16 = vmul.f32 0.03125, %v1679_v9 }
0x1211   :  { %v1683_v6 = vadd.f32 1e-05, %v1681_v16 }
0x1213   :  { %2245 = vrsqrt.f32 %v1683_v6 }
0x121c   :  { %v2244_v35 = vpop.eup %2243 }
0x121d   :  { %v1686_v36 = vmul.f32 %v2244_v35, %v1670_v44 }
0x121f   :  { %2176 = vmatprep.mubr.msk.f32.mxu1 %vm53_vm0, %v1686_v36 }
0x1220   :  { %v2246_v10 = vpop.eup %2245 }
0x1221   :  { %v1687_v37 = vmul.f32 %v2246_v10, %v1671_v5 }
0x1223   :  { %2177 = vmatmul.mubr.msk.f32.vlgmr.msra.gmra.mxu1 %vm53_vm0, %v1687_v37 }
0x12e3   :  { %v2178_v17 = vpop.f32.mrf.mxu1 }
0x12e4   :  { %v1775_v20 = vadd.f32 %v2178_v17, %v1849_v0 }
0x12e5   :  { %v1769_v21 = vpop.f32.mrf.mxu1 }
0x12e6   :  { %1779 = vst [vmem:[#allocation2 + $0x8] sm:$0xff] %v1775_v20  ;;  %v1770_v25 = vadd.f32 %v1849_v0, %v1769_v21 }
0x12e8   :  { %1778 = vst [vmem:[#allocation2] sm:$0xff] %v1770_v25 }
0x12e9   :  { %2258 = shalt.err (!%p2255_p4)
}
0x12ea   :  { %s2275_s4 = smov 128   ;;  %s2276_s11 = smov 8  }
0x12eb   :  { %1791 = dma.vmem_to_hbm [thread:$0]  %s1786_s9, 256, %s2800_s6, [#allocation3], %s2275_s4, %s2275_s4, %s2276_s11  }
0x12ec   :  { %2267 = dma.done.wait [#allocation3], 256  }
0x12ed   :  { %2268 = vsyncadd [#allocation3], 4294967040 }
0x12ee   :  { %1795 = vsyncpa [#allocation3], 1 }

</bundles_post_ra>
